<compile_context>
chip_gen: v7x
topology: tpu7x:2x2x1
jax: 0.10.0
libtpu: 0.0.40
codegen_flags: <defaults>
</compile_context>

<pallas_src>
import jax
import jax.numpy as jnp
from jax.experimental import pallas as pl
from jax.experimental.pallas import tpu as pltpu

# ---------------- configuration (small, consistent with the module) -------------
B, S = 2, 8            # batch, sequence length
BS = B * S             # 16 token rows
H = 128                # "BERT" hidden size (mini stand-in for bert-base)
FFN = 256              # encoder feed-forward size
MTL_HIDDEN = 128       # MTLModel classification-head hidden_size (default 128)
NUM_CLASSES = 4        # mapping.num_classes
NUM_ENTITIES = 2       # mapping.num_entities (asserted == 2 in the module)
VOCAB = 64
HEAD_PAD = 128         # lane-dense padding for the tiny head outputs

# ---- f32 vector-slab row indices (shape (32, 128)) ------------------------------
R_EMB_G, R_EMB_B = 0, 1
R_BQ, R_BK, R_BV = 2, 3, 4
R_BO = 5
R_LN1_G, R_LN1_B = 6, 7
R_B1A, R_B1B = 8, 9            # FFN bias b1 split into two 128-lane halves
R_B2 = 10
R_LN2_G, R_LN2_B = 11, 12
R_BC1 = 13
R_BC2 = 14                      # padded to 128 lanes (first NUM_CLASSES real)
R_BNER = 15                     # padded to 128 lanes (first NUM_ENTITIES real)
R_POS = 16                      # rows 16..31: position embeddings tiled over batch
FVEC_ROWS = R_POS + BS          # 32

# ---- bf16 weight-slab column offsets (all K = H = 128 rows) ----------------------
C_WQ = 0
C_WK = H
C_WV = 2 * H
C_WO = 3 * H
C_W1 = 4 * H                    # width FFN
C_WC1 = 4 * H + FFN             # width MTL_HIDDEN
C_WNER = C_WC1 + MTL_HIDDEN     # width HEAD_PAD
C_WC2 = C_WNER + HEAD_PAD       # width HEAD_PAD
WSLAB_COLS = C_WC2 + HEAD_PAD   # 1152


# ---------------- Pallas kernel: fused embeddings + encoder + heads ---------------
def fused_mtl_kernel(ids_ref,                     # (BS,) int32, SMEM (scalar prefetch)
                     bias_ref,                    # (BS, BS) f32 attention bias
                     fvec_ref,                    # (32, H) f32 LN/bias/pos slab
                     wslab_ref,                   # (H, 1152) bf16 packed weights
                     w2_ref,                      # (FFN, H) bf16
                     tok_ref,                     # (VOCAB, H) f32 token embeddings
                     out_ref,                     # (2*BS, H) f32 packed logits
                     emb_ref):                    # (BS, H) f32 VMEM scratch
    def frow(r):                                  # (1, H) f32 slab row
        return fvec_ref[r:r + 1, :]

    def layer_norm(v, g_row, b_row):
        mu = jnp.mean(v, axis=-1, keepdims=True)
        var = jnp.mean((v - mu) ** 2, axis=-1, keepdims=True)
        return (v - mu) * jax.lax.rsqrt(var + 1e-12) * frow(g_row) + frow(b_row)

    # ---- embedding gather (dynamic sublane reads) + position add + LayerNorm -----
    for r in range(BS):
        emb_ref[pl.ds(r, 1), :] = tok_ref[pl.ds(ids_ref[r], 1), :]
    x = emb_ref[...] + fvec_ref[R_POS:R_POS + BS, :]
    x = layer_norm(x, R_EMB_G, R_EMB_B)
    x_bf = x.astype(jnp.bfloat16)                 # cast once; keep f32 for residual

    # ---- single-head self-attention, flattened over batch*seq --------------------
    qkv = jnp.dot(x_bf, wslab_ref[:, C_WQ:C_WO],
                  preferred_element_type=jnp.float32)            # (BS, 3H)
    q = (qkv[:, 0:H] + frow(R_BQ)) * jnp.float32(1.0 / (H ** 0.5))
    k = qkv[:, H:2 * H] + frow(R_BK)
    v = qkv[:, 2 * H:3 * H] + frow(R_BV)
    scores = jnp.dot(q.astype(jnp.bfloat16), k.astype(jnp.bfloat16).T,
                     preferred_element_type=jnp.float32)          # (BS, BS)
    scores = scores + bias_ref[...]               # key-padding + block-diag batch mask
    scores = scores - jnp.max(scores, axis=-1, keepdims=True)
    p = jnp.exp(scores)
    p = p / jnp.sum(p, axis=-1, keepdims=True)    # exact divide: EUP idle, best parity
    ctx = jnp.dot(p.astype(jnp.bfloat16), v.astype(jnp.bfloat16),
                  preferred_element_type=jnp.float32)             # (BS, H)
    attn = jnp.dot(ctx.astype(jnp.bfloat16), wslab_ref[:, C_WO:C_W1],
                   preferred_element_type=jnp.float32) + frow(R_BO)
    x1 = layer_norm(x + attn, R_LN1_G, R_LN1_B)
    x1_bf = x1.astype(jnp.bfloat16)

    # ---- feed-forward -------------------------------------------------------------
    b1 = jnp.concatenate([frow(R_B1A), frow(R_B1B)], axis=1)      # (1, FFN)
    h = jax.nn.gelu(jnp.dot(x1_bf, wslab_ref[:, C_W1:C_WC1],
                            preferred_element_type=jnp.float32) + b1)
    ffn = jnp.dot(h.astype(jnp.bfloat16), w2_ref[...],
                  preferred_element_type=jnp.float32) + frow(R_B2)
    hidden = layer_norm(x1 + ffn, R_LN2_G, R_LN2_B)               # (BS, H)
    hid_bf = hidden.astype(jnp.bfloat16)

    # ---- fused MTL heads: one matmul against [wc1 | wner_pad] ----------------------
    head = jnp.dot(hid_bf, wslab_ref[:, C_WC1:C_WC2],
                   preferred_element_type=jnp.float32)            # (BS, 256)
    ner = head[:, MTL_HIDDEN:MTL_HIDDEN + HEAD_PAD] + frow(R_BNER)  # (BS, 128) padded
    z = jnp.maximum(head[:, 0:MTL_HIDDEN] + frow(R_BC1), 0.0)
    cls_all = jnp.dot(z.astype(jnp.bfloat16), wslab_ref[:, C_WC2:C_WC2 + HEAD_PAD],
                      preferred_element_type=jnp.float32) + frow(R_BC2)  # (BS, 128)

    # packed, fully lane-dense output: rows 0:BS = NER logits, BS:2BS = cls logits
    out_ref[0:BS, :] = ner
    out_ref[BS:2 * BS, :] = cls_all


def run_fused_model(input_ids, attn_bias, p):
    vmem = lambda: pl.BlockSpec(memory_space=pltpu.MemorySpace.VMEM)
    grid_spec = pltpu.PrefetchScalarGridSpec(
        num_scalar_prefetch=1,                    # input_ids -> SMEM
        grid=(1,),                                # single step: launch-latency bound
        in_specs=[vmem() for _ in range(5)],
        out_specs=vmem(),
        scratch_shapes=[pltpu.VMEM((BS, H), jnp.float32)],
    )
    out = pl.pallas_call(
        fused_mtl_kernel,
        grid_spec=grid_spec,
        out_shape=jax.ShapeDtypeStruct((2 * BS, H), jnp.float32),
        compiler_params=pltpu.CompilerParams(dimension_semantics=("arbitrary",)),
    )(input_ids.reshape(BS).astype(jnp.int32), attn_bias,
      p["fvec"], p["wslab"], p["w2"], p["tok_emb"])
    # wrapper-side slicing of the lane-dense packed output
    ner_logits = out[0:BS, :NUM_ENTITIES].reshape(B, S, NUM_ENTITIES)
    classification_logits = out[BS:2 * BS, :NUM_CLASSES].reshape(B, S, NUM_CLASSES)[:, 0, :]
    return classification_logits, ner_logits


# ---------------- plain-JAX (jitted) glue: losses ----------------------------------
def cross_entropy_loss(logits, labels):
    logz = jax.nn.logsumexp(logits, axis=-1)
    gold = jnp.take_along_axis(logits, labels[:, None], axis=-1)[:, 0]
    return jnp.mean(logz - gold)


def crf_neg_log_likelihood_mean(emissions, tags, mask, start_t, end_t, trans):
    """torchcrf CRF forward (batch_first, reduction='mean'), negated.
    SingleClassCRF with num_tags==2 falls through to the real CRF."""
    maskf = mask.astype(jnp.float32)

    # numerator: score of the gold path (torchcrf _compute_score)
    score0 = start_t[tags[:, 0]] + jnp.take_along_axis(
        emissions[:, 0], tags[:, 0:1], axis=-1)[:, 0]

    def num_step(carry, xs):
        score, prev = carry
        e_i, tag_i, m_i = xs
        e = jnp.take_along_axis(e_i, tag_i[:, None], axis=-1)[:, 0]
        score = score + (e + trans[prev, tag_i]) * m_i
        return (score, tag_i), None

    xs = (jnp.swapaxes(emissions[:, 1:], 0, 1),
          jnp.swapaxes(tags[:, 1:], 0, 1),
          jnp.swapaxes(maskf[:, 1:], 0, 1))
    (score, _), _ = jax.lax.scan(num_step, (score0, tags[:, 0]), xs)
    seq_last = jnp.sum(mask.astype(jnp.int32), axis=1) - 1
    last_tags = jnp.take_along_axis(tags, seq_last[:, None], axis=1)[:, 0]
    score = score + end_t[last_tags]

    # denominator: log partition function (torchcrf _compute_normalizer)
    def den_step(alpha, xs):
        e_i, m_i = xs
        nxt = jax.nn.logsumexp(alpha[:, :, None] + trans[None, :, :] + e_i[:, None, :],
                               axis=1)
        return jnp.where(m_i[:, None] > 0, nxt, alpha), None

    alpha0 = start_t[None, :] + emissions[:, 0]
    alpha, _ = jax.lax.scan(den_step, alpha0,
                            (jnp.swapaxes(emissions[:, 1:], 0, 1),
                             jnp.swapaxes(maskf[:, 1:], 0, 1)))
    log_z = jax.nn.logsumexp(alpha + end_t[None, :], axis=-1)
    return -jnp.mean(score - log_z)


# ---------------- full forward (single jitted launch) -------------------------------
@jax.jit
def mtl_forward(input_ids, attention_mask, params, labels, entities):
    if input_ids.shape[0] != attention_mask.shape[0]:
        raise ValueError("Input dimensions do not match.")
    p = params
    # precomputed attention bias: block-diagonal (no cross-batch) + key-padding mask
    row_batch = jnp.arange(BS, dtype=jnp.int32) // S
    same_batch = row_batch[:, None] == row_batch[None, :]
    key_ok = attention_mask.reshape(BS) > 0
    attn_bias = jnp.where(same_batch & key_ok[None, :], 0.0, -1e9).astype(jnp.float32)

    classification_logits, ner_logits = run_fused_model(input_ids, attn_bias, p)

    classification_loss = cross_entropy_loss(classification_logits, labels)
    ner_loss = crf_neg_log_likelihood_mean(
        ner_logits, entities, attention_mask.astype(bool),
        p["crf_start"], p["crf_end"], p["crf_trans"])
    total_loss = classification_loss + ner_loss
    return classification_logits, ner_logits, total_loss


# ---------------- deterministic parameter init --------------------------------------
def init_params(key):
    ks = jax.random.split(key, 16)
    n = lambda k, shape, s=0.02: jax.random.normal(k, shape, jnp.float32) * s
    tok_emb = n(ks[0], (VOCAB, H))
    pos_emb = n(ks[1], (S, H))
    wq, wk, wv = n(ks[2], (H, H)), n(ks[3], (H, H)), n(ks[4], (H, H))
    wo = n(ks[5], (H, H))
    w1 = n(ks[6], (H, FFN))
    w2 = n(ks[7], (FFN, H))
    wc1 = n(ks[8], (H, MTL_HIDDEN))
    wc2 = n(ks[9], (MTL_HIDDEN, NUM_CLASSES))
    wner = n(ks[10], (H, NUM_ENTITIES))
    wner_pad = jnp.zeros((H, HEAD_PAD), jnp.float32).at[:, :NUM_ENTITIES].set(wner)
    wc2_pad = jnp.zeros((MTL_HIDDEN, HEAD_PAD), jnp.float32).at[:, :NUM_CLASSES].set(wc2)
    # one packed bf16 weight slab for every K=128 matmul (fewer DMA descriptors)
    wslab = jnp.concatenate([wq, wk, wv, wo, w1, wc1, wner_pad, wc2_pad],
                            axis=1).astype(jnp.bfloat16)          # (H, 1152)
    assert wslab.shape == (H, WSLAB_COLS)

    ones = jnp.ones((1, H), jnp.float32)
    zeros = jnp.zeros((1, H), jnp.float32)
    fvec = jnp.concatenate(
        [ones, zeros,                    # embedding LayerNorm gamma / beta
         zeros, zeros, zeros,            # q / k / v biases
         zeros,                          # attention output bias
         ones, zeros,                    # LN1 gamma / beta
         zeros, zeros,                   # FFN b1 (two 128-lane halves)
         zeros,                          # FFN b2
         ones, zeros,                    # LN2 gamma / beta
         zeros,                          # classification-head bias 1
         zeros,                          # classification-head bias 2 (padded)
         zeros,                          # NER projection bias (padded)
         jnp.tile(pos_emb, (B, 1))],     # position embeddings tiled to (BS, H)
        axis=0)                          # (32, H) f32 slab
    assert fvec.shape == (FVEC_ROWS, H)

    return {
        "tok_emb": tok_emb,
        "fvec": fvec,
        "wslab": wslab,
        "w2": w2.astype(jnp.bfloat16),
        # CRF parameters (torchcrf init: uniform(-0.1, 0.1))
        "crf_start": jax.random.uniform(ks[11], (NUM_ENTITIES,), jnp.float32, -0.1, 0.1),
        "crf_end": jax.random.uniform(ks[12], (NUM_ENTITIES,), jnp.float32, -0.1, 0.1),
        "crf_trans": jax.random.uniform(ks[13], (NUM_ENTITIES, NUM_ENTITIES),
                                        jnp.float32, -0.1, 0.1),
    }


if __name__ == "__main__":
    key = jax.random.PRNGKey(0)
    k_par, k_ids, k_tags, k_lab = jax.random.split(key, 4)
    params = init_params(k_par)

    input_ids = jax.random.randint(k_ids, (B, S), 0, VOCAB, dtype=jnp.int32)
    attention_mask = jnp.ones((B, S), jnp.int32).at[:, S - 2:].set(0)  # last 2 padded
    entities = jax.random.randint(k_tags, (B, S), 0, NUM_ENTITIES, dtype=jnp.int32)
    labels = jax.random.randint(k_lab, (B,), 0, NUM_CLASSES, dtype=jnp.int32)

    cls_logits, ner_logits, total_loss = mtl_forward(
        input_ids, attention_mask, params, labels, entities)

    jax.block_until_ready((cls_logits, ner_logits, total_loss))
    assert cls_logits.shape == (B, NUM_CLASSES)
    assert ner_logits.shape == (B, S, NUM_ENTITIES)
    assert total_loss.shape == ()
    assert bool(jnp.isfinite(total_loss))
    print("KERNEL_OK")
</pallas_src>

<mosaic_0001>
module attributes {stable_mosaic.version = 11 : i64} {
  func.func @fused_mtl_kernel(%arg0: i32, %arg1: memref<16xi32, #tpu.memory_space<smem>>, %arg2: memref<16x16xf32, #tpu.memory_space<vmem>>, %arg3: memref<32x128xf32, #tpu.memory_space<vmem>>, %arg4: memref<128x1152xbf16, #tpu.memory_space<vmem>>, %arg5: memref<256x128xbf16, #tpu.memory_space<vmem>>, %arg6: memref<64x128xf32, #tpu.memory_space<vmem>>, %arg7: memref<32x128xf32, #tpu.memory_space<vmem>>, %arg8: memref<16x128xf32, #tpu.memory_space<vmem>>) attributes {dimension_semantics = [#tpu.dimension_semantics<arbitrary>], iteration_bounds = array<i64: 1>, scalar_prefetch = 1 : i64, scratch_operands = 1 : i64, tpu.core_type = #tpu.core_type<tc>, window_params = [{pipeline_mode = #tpu.pipeline_mode<synchronous>, transform_indices = @transform_0, window_bounds = array<i64: 16, 16>}, {pipeline_mode = #tpu.pipeline_mode<synchronous>, transform_indices = @transform_1, window_bounds = array<i64: 32, 128>}, {pipeline_mode = #tpu.pipeline_mode<synchronous>, transform_indices = @transform_2, window_bounds = array<i64: 128, 1152>}, {pipeline_mode = #tpu.pipeline_mode<synchronous>, transform_indices = @transform_3, window_bounds = array<i64: 256, 128>}, {pipeline_mode = #tpu.pipeline_mode<synchronous>, transform_indices = @transform_4, window_bounds = array<i64: 64, 128>}, {pipeline_mode = #tpu.pipeline_mode<synchronous>, transform_indices = @transform_5, window_bounds = array<i64: 32, 128>}]} {
    %c0 = arith.constant 0 : index
    %0 = memref.load %arg1[%c0] : memref<16xi32, #tpu.memory_space<smem>>
    %1 = arith.index_cast %0 : i32 to index
    %c0_0 = arith.constant 0 : index
    %2 = vector.load %arg6[%1, %c0_0] : memref<64x128xf32, #tpu.memory_space<vmem>>, vector<1x128xf32>
    %c0_1 = arith.constant 0 : index
    %c0_2 = arith.constant 0 : index
    %3 = vector.load %arg8[%c0_1, %c0_2] : memref<16x128xf32, #tpu.memory_space<vmem>>, vector<1x128xf32>
    tpu.vector_store %arg8[%c0_1, %c0_2], %2 {strides = array<i32>} : memref<16x128xf32, #tpu.memory_space<vmem>>, vector<1x128xf32>,
    %c1 = arith.constant 1 : index
    %4 = memref.load %arg1[%c1] : memref<16xi32, #tpu.memory_space<smem>>
    %5 = arith.index_cast %4 : i32 to index
    %c0_3 = arith.constant 0 : index
    %6 = vector.load %arg6[%5, %c0_3] : memref<64x128xf32, #tpu.memory_space<vmem>>, vector<1x128xf32>
    %c1_4 = arith.constant 1 : index
    %c0_5 = arith.constant 0 : index
    %7 = vector.load %arg8[%c1_4, %c0_5] : memref<16x128xf32, #tpu.memory_space<vmem>>, vector<1x128xf32>
    tpu.vector_store %arg8[%c1_4, %c0_5], %6 {strides = array<i32>} : memref<16x128xf32, #tpu.memory_space<vmem>>, vector<1x128xf32>,
    %c2 = arith.constant 2 : index
    %8 = memref.load %arg1[%c2] : memref<16xi32, #tpu.memory_space<smem>>
    %9 = arith.index_cast %8 : i32 to index
    %c0_6 = arith.constant 0 : index
    %10 = vector.load %arg6[%9, %c0_6] : memref<64x128xf32, #tpu.memory_space<vmem>>, vector<1x128xf32>
    %c2_7 = arith.constant 2 : index
    %c0_8 = arith.constant 0 : index
    %11 = vector.load %arg8[%c2_7, %c0_8] : memref<16x128xf32, #tpu.memory_space<vmem>>, vector<1x128xf32>
    tpu.vector_store %arg8[%c2_7, %c0_8], %10 {strides = array<i32>} : memref<16x128xf32, #tpu.memory_space<vmem>>, vector<1x128xf32>,
    %c3 = arith.constant 3 : index
    %12 = memref.load %arg1[%c3] : memref<16xi32, #tpu.memory_space<smem>>
    %13 = arith.index_cast %12 : i32 to index
    %c0_9 = arith.constant 0 : index
    %14 = vector.load %arg6[%13, %c0_9] : memref<64x128xf32, #tpu.memory_space<vmem>>, vector<1x128xf32>
    %c3_10 = arith.constant 3 : index
    %c0_11 = arith.constant 0 : index
    %15 = vector.load %arg8[%c3_10, %c0_11] : memref<16x128xf32, #tpu.memory_space<vmem>>, vector<1x128xf32>
    tpu.vector_store %arg8[%c3_10, %c0_11], %14 {strides = array<i32>} : memref<16x128xf32, #tpu.memory_space<vmem>>, vector<1x128xf32>,
    %c4 = arith.constant 4 : index
    %16 = memref.load %arg1[%c4] : memref<16xi32, #tpu.memory_space<smem>>
    %17 = arith.index_cast %16 : i32 to index
    %c0_12 = arith.constant 0 : index
    %18 = vector.load %arg6[%17, %c0_12] : memref<64x128xf32, #tpu.memory_space<vmem>>, vector<1x128xf32>
    %c4_13 = arith.constant 4 : index
    %c0_14 = arith.constant 0 : index
    %19 = vector.load %arg8[%c4_13, %c0_14] : memref<16x128xf32, #tpu.memory_space<vmem>>, vector<1x128xf32>
    tpu.vector_store %arg8[%c4_13, %c0_14], %18 {strides = array<i32>} : memref<16x128xf32, #tpu.memory_space<vmem>>, vector<1x128xf32>,
    %c5 = arith.constant 5 : index
    %20 = memref.load %arg1[%c5] : memref<16xi32, #tpu.memory_space<smem>>
    %21 = arith.index_cast %20 : i32 to index
    %c0_15 = arith.constant 0 : index
    %22 = vector.load %arg6[%21, %c0_15] : memref<64x128xf32, #tpu.memory_space<vmem>>, vector<1x128xf32>
    %c5_16 = arith.constant 5 : index
    %c0_17 = arith.constant 0 : index
    %23 = vector.load %arg8[%c5_16, %c0_17] : memref<16x128xf32, #tpu.memory_space<vmem>>, vector<1x128xf32>
    tpu.vector_store %arg8[%c5_16, %c0_17], %22 {strides = array<i32>} : memref<16x128xf32, #tpu.memory_space<vmem>>, vector<1x128xf32>,
    %c6 = arith.constant 6 : index
    %24 = memref.load %arg1[%c6] : memref<16xi32, #tpu.memory_space<smem>>
    %25 = arith.index_cast %24 : i32 to index
    %c0_18 = arith.constant 0 : index
    %26 = vector.load %arg6[%25, %c0_18] : memref<64x128xf32, #tpu.memory_space<vmem>>, vector<1x128xf32>
    %c6_19 = arith.constant 6 : index
    %c0_20 = arith.constant 0 : index
    %27 = vector.load %arg8[%c6_19, %c0_20] : memref<16x128xf32, #tpu.memory_space<vmem>>, vector<1x128xf32>
    tpu.vector_store %arg8[%c6_19, %c0_20], %26 {strides = array<i32>} : memref<16x128xf32, #tpu.memory_space<vmem>>, vector<1x128xf32>,
    %c7 = arith.constant 7 : index
    %28 = memref.load %arg1[%c7] : memref<16xi32, #tpu.memory_space<smem>>
    %29 = arith.index_cast %28 : i32 to index
    %c0_21 = arith.constant 0 : index
    %30 = vector.load %arg6[%29, %c0_21] : memref<64x128xf32, #tpu.memory_space<vmem>>, vector<1x128xf32>
    %c7_22 = arith.constant 7 : index
    %c0_23 = arith.constant 0 : index
    %31 = vector.load %arg8[%c7_22, %c0_23] : memref<16x128xf32, #tpu.memory_space<vmem>>, vector<1x128xf32>
    tpu.vector_store %arg8[%c7_22, %c0_23], %30 {strides = array<i32>} : memref<16x128xf32, #tpu.memory_space<vmem>>, vector<1x128xf32>,
    %c8 = arith.constant 8 : index
    %32 = memref.load %arg1[%c8] : memref<16xi32, #tpu.memory_space<smem>>
    %33 = arith.index_cast %32 : i32 to index
    %c0_24 = arith.constant 0 : index
    %34 = vector.load %arg6[%33, %c0_24] : memref<64x128xf32, #tpu.memory_space<vmem>>, vector<1x128xf32>
    %c8_25 = arith.constant 8 : index
    %c0_26 = arith.constant 0 : index
    %35 = vector.load %arg8[%c8_25, %c0_26] : memref<16x128xf32, #tpu.memory_space<vmem>>, vector<1x128xf32>
    tpu.vector_store %arg8[%c8_25, %c0_26], %34 {strides = array<i32>} : memref<16x128xf32, #tpu.memory_space<vmem>>, vector<1x128xf32>,
    %c9 = arith.constant 9 : index
    %36 = memref.load %arg1[%c9] : memref<16xi32, #tpu.memory_space<smem>>
    %37 = arith.index_cast %36 : i32 to index
    %c0_27 = arith.constant 0 : index
    %38 = vector.load %arg6[%37, %c0_27] : memref<64x128xf32, #tpu.memory_space<vmem>>, vector<1x128xf32>
    %c9_28 = arith.constant 9 : index
    %c0_29 = arith.constant 0 : index
    %39 = vector.load %arg8[%c9_28, %c0_29] : memref<16x128xf32, #tpu.memory_space<vmem>>, vector<1x128xf32>
    tpu.vector_store %arg8[%c9_28, %c0_29], %38 {strides = array<i32>} : memref<16x128xf32, #tpu.memory_space<vmem>>, vector<1x128xf32>,
    %c10 = arith.constant 10 : index
    %40 = memref.load %arg1[%c10] : memref<16xi32, #tpu.memory_space<smem>>
    %41 = arith.index_cast %40 : i32 to index
    %c0_30 = arith.constant 0 : index
    %42 = vector.load %arg6[%41, %c0_30] : memref<64x128xf32, #tpu.memory_space<vmem>>, vector<1x128xf32>
    %c10_31 = arith.constant 10 : index
    %c0_32 = arith.constant 0 : index
    %43 = vector.load %arg8[%c10_31, %c0_32] : memref<16x128xf32, #tpu.memory_space<vmem>>, vector<1x128xf32>
    tpu.vector_store %arg8[%c10_31, %c0_32], %42 {strides = array<i32>} : memref<16x128xf32, #tpu.memory_space<vmem>>, vector<1x128xf32>,
    %c11 = arith.constant 11 : index
    %44 = memref.load %arg1[%c11] : memref<16xi32, #tpu.memory_space<smem>>
    %45 = arith.index_cast %44 : i32 to index
    %c0_33 = arith.constant 0 : index
    %46 = vector.load %arg6[%45, %c0_33] : memref<64x128xf32, #tpu.memory_space<vmem>>, vector<1x128xf32>
    %c11_34 = arith.constant 11 : index
    %c0_35 = arith.constant 0 : index
    %47 = vector.load %arg8[%c11_34, %c0_35] : memref<16x128xf32, #tpu.memory_space<vmem>>, vector<1x128xf32>
    tpu.vector_store %arg8[%c11_34, %c0_35], %46 {strides = array<i32>} : memref<16x128xf32, #tpu.memory_space<vmem>>, vector<1x128xf32>,
    %c12 = arith.constant 12 : index
    %48 = memref.load %arg1[%c12] : memref<16xi32, #tpu.memory_space<smem>>
    %49 = arith.index_cast %48 : i32 to index
    %c0_36 = arith.constant 0 : index
    %50 = vector.load %arg6[%49, %c0_36] : memref<64x128xf32, #tpu.memory_space<vmem>>, vector<1x128xf32>
    %c12_37 = arith.constant 12 : index
    %c0_38 = arith.constant 0 : index
    %51 = vector.load %arg8[%c12_37, %c0_38] : memref<16x128xf32, #tpu.memory_space<vmem>>, vector<1x128xf32>
    tpu.vector_store %arg8[%c12_37, %c0_38], %50 {strides = array<i32>} : memref<16x128xf32, #tpu.memory_space<vmem>>, vector<1x128xf32>,
    %c13 = arith.constant 13 : index
    %52 = memref.load %arg1[%c13] : memref<16xi32, #tpu.memory_space<smem>>
    %53 = arith.index_cast %52 : i32 to index
    %c0_39 = arith.constant 0 : index
    %54 = vector.load %arg6[%53, %c0_39] : memref<64x128xf32, #tpu.memory_space<vmem>>, vector<1x128xf32>
    %c13_40 = arith.constant 13 : index
    %c0_41 = arith.constant 0 : index
    %55 = vector.load %arg8[%c13_40, %c0_41] : memref<16x128xf32, #tpu.memory_space<vmem>>, vector<1x128xf32>
    tpu.vector_store %arg8[%c13_40, %c0_41], %54 {strides = array<i32>} : memref<16x128xf32, #tpu.memory_space<vmem>>, vector<1x128xf32>,
    %c14 = arith.constant 14 : index
    %56 = memref.load %arg1[%c14] : memref<16xi32, #tpu.memory_space<smem>>
    %57 = arith.index_cast %56 : i32 to index
    %c0_42 = arith.constant 0 : index
    %58 = vector.load %arg6[%57, %c0_42] : memref<64x128xf32, #tpu.memory_space<vmem>>, vector<1x128xf32>
    %c14_43 = arith.constant 14 : index
    %c0_44 = arith.constant 0 : index
    %59 = vector.load %arg8[%c14_43, %c0_44] : memref<16x128xf32, #tpu.memory_space<vmem>>, vector<1x128xf32>
    tpu.vector_store %arg8[%c14_43, %c0_44], %58 {strides = array<i32>} : memref<16x128xf32, #tpu.memory_space<vmem>>, vector<1x128xf32>,
    %c15 = arith.constant 15 : index
    %60 = memref.load %arg1[%c15] : memref<16xi32, #tpu.memory_space<smem>>
    %61 = arith.index_cast %60 : i32 to index
    %c0_45 = arith.constant 0 : index
    %62 = vector.load %arg6[%61, %c0_45] : memref<64x128xf32, #tpu.memory_space<vmem>>, vector<1x128xf32>
    %c15_46 = arith.constant 15 : index
    %c0_47 = arith.constant 0 : index
    %63 = vector.load %arg8[%c15_46, %c0_47] : memref<16x128xf32, #tpu.memory_space<vmem>>, vector<1x128xf32>
    tpu.vector_store %arg8[%c15_46, %c0_47], %62 {strides = array<i32>} : memref<16x128xf32, #tpu.memory_space<vmem>>, vector<1x128xf32>,
    %c0_48 = arith.constant 0 : index
    %c0_49 = arith.constant 0 : index
    %64 = vector.load %arg8[%c0_48, %c0_49] : memref<16x128xf32, #tpu.memory_space<vmem>>, vector<16x128xf32>
    %c16 = arith.constant 16 : index
    %c0_50 = arith.constant 0 : index
    %65 = vector.load %arg3[%c16, %c0_50] : memref<32x128xf32, #tpu.memory_space<vmem>>, vector<16x128xf32>
    %66 = arith.addf %64, %65 : vector<16x128xf32>
    %cst = arith.constant dense<0.000000e+00> : vector<16xf32>
    %67 = vector.multi_reduction <add>, %66, %cst [1] : vector<16x128xf32> to vector<16xf32>
    %68 = vector.shape_cast %67 : vector<16xf32> to vector<16x1xf32>
    %cst_51 = arith.constant 1.280000e+02 : f32
    %69 = vector.broadcast %cst_51 : f32 to vector<16x1xf32>
    %70 = arith.divf %68, %69 : vector<16x1xf32>
    %71 = vector.broadcast %70 : vector<16x1xf32> to vector<16x128xf32>
    %72 = arith.subf %66, %71 : vector<16x128xf32>
    %73 = arith.mulf %72, %72 : vector<16x128xf32>
    %cst_52 = arith.constant dense<0.000000e+00> : vector<16xf32>
    %74 = vector.multi_reduction <add>, %73, %cst_52 [1] : vector<16x128xf32> to vector<16xf32>
    %75 = vector.shape_cast %74 : vector<16xf32> to vector<16x1xf32>
    %cst_53 = arith.constant 1.280000e+02 : f32
    %76 = vector.broadcast %cst_53 : f32 to vector<16x1xf32>
    %77 = arith.divf %75, %76 : vector<16x1xf32>
    %78 = vector.broadcast %70 : vector<16x1xf32> to vector<16x128xf32>
    %79 = arith.subf %66, %78 : vector<16x128xf32>
    %cst_54 = arith.constant 9.99999996E-13 : f32
    %80 = vector.broadcast %cst_54 : f32 to vector<16x1xf32>
    %81 = arith.addf %77, %80 : vector<16x1xf32>
    %82 = math.rsqrt %81 : vector<16x1xf32>
    %83 = vector.broadcast %82 : vector<16x1xf32> to vector<16x128xf32>
    %84 = arith.mulf %79, %83 : vector<16x128xf32>
    %c0_55 = arith.constant 0 : index
    %c0_56 = arith.constant 0 : index
    %85 = vector.load %arg3[%c0_55, %c0_56] : memref<32x128xf32, #tpu.memory_space<vmem>>, vector<1x128xf32>
    %86 = vector.broadcast %85 : vector<1x128xf32> to vector<16x128xf32>
    %87 = arith.mulf %84, %86 : vector<16x128xf32>
    %c1_57 = arith.constant 1 : index
    %c0_58 = arith.constant 0 : index
    %88 = vector.load %arg3[%c1_57, %c0_58] : memref<32x128xf32, #tpu.memory_space<vmem>>, vector<1x128xf32>
    %89 = vector.broadcast %88 : vector<1x128xf32> to vector<16x128xf32>
    %90 = arith.addf %87, %89 : vector<16x128xf32>
    %91 = arith.truncf %90 : vector<16x128xf32> to vector<16x128xbf16>
    %c0_59 = arith.constant 0 : index
    %c0_60 = arith.constant 0 : index
    %92 = vector.load %arg4[%c0_59, %c0_60] : memref<128x1152xbf16, #tpu.memory_space<vmem>>, vector<128x384xbf16>
    %cst_61 = arith.constant dense<0.000000e+00> : vector<16x384xf32>
    %93 = tpu.matmul %91, %92, %cst_61 {dimension_numbers = #tpu.dot_dimension_numbers<[1], [0], [0], [1], [0, 0, 1, 1], [], []>} : vector<16x128xbf16>, vector<128x384xbf16>, vector<16x384xf32> -> vector<16x384xf32>
    %94 = vector.extract_strided_slice %93 {offsets = [0, 0], sizes = [16, 128], strides = [1, 1]} : vector<16x384xf32> to vector<16x128xf32>
    %c2_62 = arith.constant 2 : index
    %c0_63 = arith.constant 0 : index
    %95 = vector.load %arg3[%c2_62, %c0_63] : memref<32x128xf32, #tpu.memory_space<vmem>>, vector<1x128xf32>
    %96 = vector.broadcast %95 : vector<1x128xf32> to vector<16x128xf32>
    %97 = arith.addf %94, %96 : vector<16x128xf32>
    %cst_64 = arith.constant 0.0883883461 : f32
    %98 = vector.broadcast %cst_64 : f32 to vector<16x128xf32>
    %99 = arith.mulf %97, %98 : vector<16x128xf32>
    %100 = vector.extract_strided_slice %93 {offsets = [0, 128], sizes = [16, 128], strides = [1, 1]} : vector<16x384xf32> to vector<16x128xf32>
    %c3_65 = arith.constant 3 : index
    %c0_66 = arith.constant 0 : index
    %101 = vector.load %arg3[%c3_65, %c0_66] : memref<32x128xf32, #tpu.memory_space<vmem>>, vector<1x128xf32>
    %102 = vector.broadcast %101 : vector<1x128xf32> to vector<16x128xf32>
    %103 = arith.addf %100, %102 : vector<16x128xf32>
    %104 = vector.extract_strided_slice %93 {offsets = [0, 256], sizes = [16, 128], strides = [1, 1]} : vector<16x384xf32> to vector<16x128xf32>
    %c4_67 = arith.constant 4 : index
    %c0_68 = arith.constant 0 : index
    %105 = vector.load %arg3[%c4_67, %c0_68] : memref<32x128xf32, #tpu.memory_space<vmem>>, vector<1x128xf32>
    %106 = vector.broadcast %105 : vector<1x128xf32> to vector<16x128xf32>
    %107 = arith.addf %104, %106 : vector<16x128xf32>
    %108 = arith.truncf %99 : vector<16x128xf32> to vector<16x128xbf16>
    %109 = arith.truncf %103 : vector<16x128xf32> to vector<16x128xbf16>
    %110 = tpu.transpose %109, [1, 0] : vector<16x128xbf16> -> vector<128x16xbf16>
    %cst_69 = arith.constant dense<0.000000e+00> : vector<16x16xf32>
    %111 = tpu.matmul %108, %110, %cst_69 {dimension_numbers = #tpu.dot_dimension_numbers<[1], [0], [0], [1], [0, 0, 1, 1], [], []>} : vector<16x128xbf16>, vector<128x16xbf16>, vector<16x16xf32> -> vector<16x16xf32>
    %c0_70 = arith.constant 0 : index
    %c0_71 = arith.constant 0 : index
    %112 = vector.load %arg2[%c0_70, %c0_71] : memref<16x16xf32, #tpu.memory_space<vmem>>, vector<16x16xf32>
    %113 = arith.addf %111, %112 : vector<16x16xf32>
    %cst_72 = arith.constant dense<0xFF800000> : vector<16xf32>
    %114 = vector.multi_reduction <maximumf>, %113, %cst_72 [1] : vector<16x16xf32> to vector<16xf32>
    %115 = vector.shape_cast %114 : vector<16xf32> to vector<16x1xf32>
    %116 = vector.broadcast %115 : vector<16x1xf32> to vector<16x16xf32>
    %117 = arith.subf %113, %116 : vector<16x16xf32>
    %118 = math.exp %117 : vector<16x16xf32>
    %cst_73 = arith.constant dense<0.000000e+00> : vector<16xf32>
    %119 = vector.multi_reduction <add>, %118, %cst_73 [1] : vector<16x16xf32> to vector<16xf32>
    %120 = vector.shape_cast %119 : vector<16xf32> to vector<16x1xf32>
    %121 = vector.broadcast %120 : vector<16x1xf32> to vector<16x16xf32>
    %122 = arith.divf %118, %121 : vector<16x16xf32>
    %123 = arith.truncf %122 : vector<16x16xf32> to vector<16x16xbf16>
    %124 = arith.truncf %107 : vector<16x128xf32> to vector<16x128xbf16>
    %cst_74 = arith.constant dense<0.000000e+00> : vector<16x128xf32>
    %125 = tpu.matmul %123, %124, %cst_74 {dimension_numbers = #tpu.dot_dimension_numbers<[1], [0], [0], [1], [0, 0, 1, 1], [], []>} : vector<16x16xbf16>, vector<16x128xbf16>, vector<16x128xf32> -> vector<16x128xf32>
    %126 = arith.truncf %125 : vector<16x128xf32> to vector<16x128xbf16>
    %c0_75 = arith.constant 0 : index
    %c384 = arith.constant 384 : index
    %127 = vector.load %arg4[%c0_75, %c384] : memref<128x1152xbf16, #tpu.memory_space<vmem>>, vector<128x128xbf16>
    %cst_76 = arith.constant dense<0.000000e+00> : vector<16x128xf32>
    %128 = tpu.matmul %126, %127, %cst_76 {dimension_numbers = #tpu.dot_dimension_numbers<[1], [0], [0], [1], [0, 0, 1, 1], [], []>} : vector<16x128xbf16>, vector<128x128xbf16>, vector<16x128xf32> -> vector<16x128xf32>
    %c5_77 = arith.constant 5 : index
    %c0_78 = arith.constant 0 : index
    %129 = vector.load %arg3[%c5_77, %c0_78] : memref<32x128xf32, #tpu.memory_space<vmem>>, vector<1x128xf32>
    %130 = vector.broadcast %129 : vector<1x128xf32> to vector<16x128xf32>
    %131 = arith.addf %128, %130 : vector<16x128xf32>
    %132 = arith.addf %90, %131 : vector<16x128xf32>
    %cst_79 = arith.constant dense<0.000000e+00> : vector<16xf32>
    %133 = vector.multi_reduction <add>, %132, %cst_79 [1] : vector<16x128xf32> to vector<16xf32>
    %134 = vector.shape_cast %133 : vector<16xf32> to vector<16x1xf32>
    %cst_80 = arith.constant 1.280000e+02 : f32
    %135 = vector.broadcast %cst_80 : f32 to vector<16x1xf32>
    %136 = arith.divf %134, %135 : vector<16x1xf32>
    %137 = vector.broadcast %136 : vector<16x1xf32> to vector<16x128xf32>
    %138 = arith.subf %132, %137 : vector<16x128xf32>
    %139 = arith.mulf %138, %138 : vector<16x128xf32>
    %cst_81 = arith.constant dense<0.000000e+00> : vector<16xf32>
    %140 = vector.multi_reduction <add>, %139, %cst_81 [1] : vector<16x128xf32> to vector<16xf32>
    %141 = vector.shape_cast %140 : vector<16xf32> to vector<16x1xf32>
    %cst_82 = arith.constant 1.280000e+02 : f32
    %142 = vector.broadcast %cst_82 : f32 to vector<16x1xf32>
    %143 = arith.divf %141, %142 : vector<16x1xf32>
    %144 = vector.broadcast %136 : vector<16x1xf32> to vector<16x128xf32>
    %145 = arith.subf %132, %144 : vector<16x128xf32>
    %cst_83 = arith.constant 9.99999996E-13 : f32
    %146 = vector.broadcast %cst_83 : f32 to vector<16x1xf32>
    %147 = arith.addf %143, %146 : vector<16x1xf32>
    %148 = math.rsqrt %147 : vector<16x1xf32>
    %149 = vector.broadcast %148 : vector<16x1xf32> to vector<16x128xf32>
    %150 = arith.mulf %145, %149 : vector<16x128xf32>
    %c6_84 = arith.constant 6 : index
    %c0_85 = arith.constant 0 : index
    %151 = vector.load %arg3[%c6_84, %c0_85] : memref<32x128xf32, #tpu.memory_space<vmem>>, vector<1x128xf32>
    %152 = vector.broadcast %151 : vector<1x128xf32> to vector<16x128xf32>
    %153 = arith.mulf %150, %152 : vector<16x128xf32>
    %c7_86 = arith.constant 7 : index
    %c0_87 = arith.constant 0 : index
    %154 = vector.load %arg3[%c7_86, %c0_87] : memref<32x128xf32, #tpu.memory_space<vmem>>, vector<1x128xf32>
    %155 = vector.broadcast %154 : vector<1x128xf32> to vector<16x128xf32>
    %156 = arith.addf %153, %155 : vector<16x128xf32>
    %157 = arith.truncf %156 : vector<16x128xf32> to vector<16x128xbf16>
    %c8_88 = arith.constant 8 : index
    %c0_89 = arith.constant 0 : index
    %158 = vector.load %arg3[%c8_88, %c0_89] : memref<32x128xf32, #tpu.memory_space<vmem>>, vector<1x128xf32>
    %c9_90 = arith.constant 9 : index
    %c0_91 = arith.constant 0 : index
    %159 = vector.load %arg3[%c9_90, %c0_91] : memref<32x128xf32, #tpu.memory_space<vmem>>, vector<1x128xf32>
    %160 = tpu.concatenate %158, %159 in 1 : vector<1x128xf32>, vector<1x128xf32> -> vector<1x256xf32>
    %c0_92 = arith.constant 0 : index
    %c512 = arith.constant 512 : index
    %161 = vector.load %arg4[%c0_92, %c512] : memref<128x1152xbf16, #tpu.memory_space<vmem>>, vector<128x256xbf16>
    %cst_93 = arith.constant dense<0.000000e+00> : vector<16x256xf32>
    %162 = tpu.matmul %157, %161, %cst_93 {dimension_numbers = #tpu.dot_dimension_numbers<[1], [0], [0], [1], [0, 0, 1, 1], [], []>} : vector<16x128xbf16>, vector<128x256xbf16>, vector<16x256xf32> -> vector<16x256xf32>
    %163 = vector.broadcast %160 : vector<1x256xf32> to vector<16x256xf32>
    %164 = arith.addf %162, %163 : vector<16x256xf32>
    %165 = arith.mulf %164, %164 : vector<16x256xf32>
    %166 = arith.mulf %164, %165 : vector<16x256xf32>
    %cst_94 = arith.constant 4.471500e-02 : f32
    %167 = vector.broadcast %cst_94 : f32 to vector<16x256xf32>
    %168 = arith.mulf %167, %166 : vector<16x256xf32>
    %169 = arith.addf %164, %168 : vector<16x256xf32>
    %cst_95 = arith.constant 0.797884583 : f32
    %170 = vector.broadcast %cst_95 : f32 to vector<16x256xf32>
    %171 = arith.mulf %170, %169 : vector<16x256xf32>
    %172 = math.tanh %171 : vector<16x256xf32>
    %cst_96 = arith.constant 1.000000e+00 : f32
    %173 = vector.broadcast %cst_96 : f32 to vector<16x256xf32>
    %174 = arith.addf %173, %172 : vector<16x256xf32>
    %cst_97 = arith.constant 5.000000e-01 : f32
    %175 = vector.broadcast %cst_97 : f32 to vector<16x256xf32>
    %176 = arith.mulf %175, %174 : vector<16x256xf32>
    %177 = arith.mulf %164, %176 : vector<16x256xf32>
    %178 = arith.truncf %177 : vector<16x256xf32> to vector<16x256xbf16>
    %c0_98 = arith.constant 0 : index
    %c0_99 = arith.constant 0 : index
    %179 = vector.load %arg5[%c0_98, %c0_99] : memref<256x128xbf16, #tpu.memory_space<vmem>>, vector<256x128xbf16>
    %cst_100 = arith.constant dense<0.000000e+00> : vector<16x128xf32>
    %180 = tpu.matmul %178, %179, %cst_100 {dimension_numbers = #tpu.dot_dimension_numbers<[1], [0], [0], [1], [0, 0, 1, 1], [], []>} : vector<16x256xbf16>, vector<256x128xbf16>, vector<16x128xf32> -> vector<16x128xf32>
    %c10_101 = arith.constant 10 : index
    %c0_102 = arith.constant 0 : index
    %181 = vector.load %arg3[%c10_101, %c0_102] : memref<32x128xf32, #tpu.memory_space<vmem>>, vector<1x128xf32>
    %182 = vector.broadcast %181 : vector<1x128xf32> to vector<16x128xf32>
    %183 = arith.addf %180, %182 : vector<16x128xf32>
    %184 = arith.addf %156, %183 : vector<16x128xf32>
    %cst_103 = arith.constant dense<0.000000e+00> : vector<16xf32>
    %185 = vector.multi_reduction <add>, %184, %cst_103 [1] : vector<16x128xf32> to vector<16xf32>
    %186 = vector.shape_cast %185 : vector<16xf32> to vector<16x1xf32>
    %cst_104 = arith.constant 1.280000e+02 : f32
    %187 = vector.broadcast %cst_104 : f32 to vector<16x1xf32>
    %188 = arith.divf %186, %187 : vector<16x1xf32>
    %189 = vector.broadcast %188 : vector<16x1xf32> to vector<16x128xf32>
    %190 = arith.subf %184, %189 : vector<16x128xf32>
    %191 = arith.mulf %190, %190 : vector<16x128xf32>
    %cst_105 = arith.constant dense<0.000000e+00> : vector<16xf32>
    %192 = vector.multi_reduction <add>, %191, %cst_105 [1] : vector<16x128xf32> to vector<16xf32>
    %193 = vector.shape_cast %192 : vector<16xf32> to vector<16x1xf32>
    %cst_106 = arith.constant 1.280000e+02 : f32
    %194 = vector.broadcast %cst_106 : f32 to vector<16x1xf32>
    %195 = arith.divf %193, %194 : vector<16x1xf32>
    %196 = vector.broadcast %188 : vector<16x1xf32> to vector<16x128xf32>
    %197 = arith.subf %184, %196 : vector<16x128xf32>
    %cst_107 = arith.constant 9.99999996E-13 : f32
    %198 = vector.broadcast %cst_107 : f32 to vector<16x1xf32>
    %199 = arith.addf %195, %198 : vector<16x1xf32>
    %200 = math.rsqrt %199 : vector<16x1xf32>
    %201 = vector.broadcast %200 : vector<16x1xf32> to vector<16x128xf32>
    %202 = arith.mulf %197, %201 : vector<16x128xf32>
    %c11_108 = arith.constant 11 : index
    %c0_109 = arith.constant 0 : index
    %203 = vector.load %arg3[%c11_108, %c0_109] : memref<32x128xf32, #tpu.memory_space<vmem>>, vector<1x128xf32>
    %204 = vector.broadcast %203 : vector<1x128xf32> to vector<16x128xf32>
    %205 = arith.mulf %202, %204 : vector<16x128xf32>
    %c12_110 = arith.constant 12 : index
    %c0_111 = arith.constant 0 : index
    %206 = vector.load %arg3[%c12_110, %c0_111] : memref<32x128xf32, #tpu.memory_space<vmem>>, vector<1x128xf32>
    %207 = vector.broadcast %206 : vector<1x128xf32> to vector<16x128xf32>
    %208 = arith.addf %205, %207 : vector<16x128xf32>
    %209 = arith.truncf %208 : vector<16x128xf32> to vector<16x128xbf16>
    %c0_112 = arith.constant 0 : index
    %c768 = arith.constant 768 : index
    %210 = vector.load %arg4[%c0_112, %c768] : memref<128x1152xbf16, #tpu.memory_space<vmem>>, vector<128x256xbf16>
    %cst_113 = arith.constant dense<0.000000e+00> : vector<16x256xf32>
    %211 = tpu.matmul %209, %210, %cst_113 {dimension_numbers = #tpu.dot_dimension_numbers<[1], [0], [0], [1], [0, 0, 1, 1], [], []>} : vector<16x128xbf16>, vector<128x256xbf16>, vector<16x256xf32> -> vector<16x256xf32>
    %212 = vector.extract_strided_slice %211 {offsets = [0, 128], sizes = [16, 128], strides = [1, 1]} : vector<16x256xf32> to vector<16x128xf32>
    %c15_114 = arith.constant 15 : index
    %c0_115 = arith.constant 0 : index
    %213 = vector.load %arg3[%c15_114, %c0_115] : memref<32x128xf32, #tpu.memory_space<vmem>>, vector<1x128xf32>
    %214 = vector.broadcast %213 : vector<1x128xf32> to vector<16x128xf32>
    %215 = arith.addf %212, %214 : vector<16x128xf32>
    %216 = vector.extract_strided_slice %211 {offsets = [0, 0], sizes = [16, 128], strides = [1, 1]} : vector<16x256xf32> to vector<16x128xf32>
    %c13_116 = arith.constant 13 : index
    %c0_117 = arith.constant 0 : index
    %217 = vector.load %arg3[%c13_116, %c0_117] : memref<32x128xf32, #tpu.memory_space<vmem>>, vector<1x128xf32>
    %218 = vector.broadcast %217 : vector<1x128xf32> to vector<16x128xf32>
    %219 = arith.addf %216, %218 : vector<16x128xf32>
    %cst_118 = arith.constant 0.000000e+00 : f32
    %220 = vector.broadcast %cst_118 : f32 to vector<16x128xf32>
    %221 = arith.maximumf %219, %220 : vector<16x128xf32>
    %222 = arith.truncf %221 : vector<16x128xf32> to vector<16x128xbf16>
    %c0_119 = arith.constant 0 : index
    %c1024 = arith.constant 1024 : index
    %223 = vector.load %arg4[%c0_119, %c1024] : memref<128x1152xbf16, #tpu.memory_space<vmem>>, vector<128x128xbf16>
    %cst_120 = arith.constant dense<0.000000e+00> : vector<16x128xf32>
    %224 = tpu.matmul %222, %223, %cst_120 {dimension_numbers = #tpu.dot_dimension_numbers<[1], [0], [0], [1], [0, 0, 1, 1], [], []>} : vector<16x128xbf16>, vector<128x128xbf16>, vector<16x128xf32> -> vector<16x128xf32>
    %c14_121 = arith.constant 14 : index
    %c0_122 = arith.constant 0 : index
    %225 = vector.load %arg3[%c14_121, %c0_122] : memref<32x128xf32, #tpu.memory_space<vmem>>, vector<1x128xf32>
    %226 = vector.broadcast %225 : vector<1x128xf32> to vector<16x128xf32>
    %227 = arith.addf %224, %226 : vector<16x128xf32>
    %c0_123 = arith.constant 0 : index
    %c0_124 = arith.constant 0 : index
    %228 = vector.load %arg7[%c0_123, %c0_124] : memref<32x128xf32, #tpu.memory_space<vmem>>, vector<16x128xf32>
    tpu.vector_store %arg7[%c0_123, %c0_124], %215 {strides = array<i32>} : memref<32x128xf32, #tpu.memory_space<vmem>>, vector<16x128xf32>,
    %c16_125 = arith.constant 16 : index
    %c0_126 = arith.constant 0 : index
    %229 = vector.load %arg7[%c16_125, %c0_126] : memref<32x128xf32, #tpu.memory_space<vmem>>, vector<16x128xf32>
    tpu.vector_store %arg7[%c16_125, %c0_126], %227 {strides = array<i32>} : memref<32x128xf32, #tpu.memory_space<vmem>>, vector<16x128xf32>,
    return
  }
  func.func @transform_0(%arg0: i32, %arg1: memref<16xi32, #tpu.memory_space<smem>>) -> (i32, i32) {
    %c0_i32 = arith.constant 0 : i32
    %c0_i32_0 = arith.constant 0 : i32
    %c0_i32_1 = arith.constant 0 : i32
    return %c0_i32, %c0_i32_0 : i32, i32
  }
  func.func @transform_1(%arg0: i32, %arg1: memref<16xi32, #tpu.memory_space<smem>>) -> (i32, i32) {
    %c0_i32 = arith.constant 0 : i32
    %c0_i32_0 = arith.constant 0 : i32
    %c0_i32_1 = arith.constant 0 : i32
    return %c0_i32, %c0_i32_0 : i32, i32
  }
  func.func @transform_2(%arg0: i32, %arg1: memref<16xi32, #tpu.memory_space<smem>>) -> (i32, i32) {
    %c0_i32 = arith.constant 0 : i32
    %c0_i32_0 = arith.constant 0 : i32
    %c0_i32_1 = arith.constant 0 : i32
    return %c0_i32, %c0_i32_0 : i32, i32
  }
  func.func @transform_3(%arg0: i32, %arg1: memref<16xi32, #tpu.memory_space<smem>>) -> (i32, i32) {
    %c0_i32 = arith.constant 0 : i32
    %c0_i32_0 = arith.constant 0 : i32
    %c0_i32_1 = arith.constant 0 : i32
    return %c0_i32, %c0_i32_0 : i32, i32
  }
  func.func @transform_4(%arg0: i32, %arg1: memref<16xi32, #tpu.memory_space<smem>>) -> (i32, i32) {
    %c0_i32 = arith.constant 0 : i32
    %c0_i32_0 = arith.constant 0 : i32
    %c0_i32_1 = arith.constant 0 : i32
    return %c0_i32, %c0_i32_0 : i32, i32
  }
  func.func @transform_5(%arg0: i32, %arg1: memref<16xi32, #tpu.memory_space<smem>>) -> (i32, i32) {
    %c0_i32 = arith.constant 0 : i32
    %c0_i32_0 = arith.constant 0 : i32
    %c0_i32_1 = arith.constant 0 : i32
    return %c0_i32, %c0_i32_0 : i32, i32
  }
}

</mosaic_0001>

<bundles_post_ra>
// kernel: mtl_forward.1
= control target key start
LH: loop header
LB: loop body
LE: loop exit
PB: predicated region body
PF: predicated region fallthrough
CT: control target
= control target key end

     0   :  { %s2117_s0 = inlined_call_operand.vmem [shape: s32[16], index: 0, kind: input, shape index: {}]   ;;  %s2118_s1 = inlined_call_operand.vmem [shape: f32[16,16], index: 1, kind: input, shape index: {}]   ;;  %s2119_s2 = inlined_call_operand.hbm [shape: f32[32,128], index: 2, kind: input, shape index: {}]   ;;  %s2120_s3 = inlined_call_operand.hbm [shape: bf16[128,1152], index: 3, kind: input, shape index: {}]   ;;  %s2121_s4 = inlined_call_operand.hbm [shape: bf16[256,128], index: 4, kind: input, shape index: {}]   ;;  %s2122_s5 = inlined_call_operand.vmem [shape: f32[64,128], index: 5, kind: input, shape index: {}]   ;;  %s2123_s6 = inlined_call_operand.vmem [shape: f32[32,128], index: 6, kind: output, shape index: {}]  }
   0x1   :  { %s11_s23 = sshll.u32 %s2117_s0, 4  ;;  %s12_s23 = int_to_ptr.vmem [resolvable:$true] %s11_s23 }
   0x2   :  { %s1798_s24 = scalar_lea.vmem %s12_s23, 16  ;;  %p1803_p1 = scmp.lt.s32.totalorder %s12_s23, %s12_s23 }
   0x3   :  { %p1799_p0 = scmp.ne.s32.totalorder %s12_s23, %s1798_s24  ;;  %p1804_p2 = scmp.lt.s32.totalorder %s1798_s24, %s1798_s24 }
   0x5   :  { %p1805_p3 = por %p1804_p2, %p1803_p1 }
   0x7   :  { %p1806_p4 = pnand %p1805_p3, %p1799_p0 }
   0x9   :  { %1809 = shalt.err (!%p1806_p4)  }
   0xa   :  { %s1882_s25 = smov [#allocation4]  }
   0xb   :  { %14 = dma.vmem_to_smem %s12_s23, 16, %s1882_s25, [#allocation3] }
   0xc   :  { %1876 = dma.done.wait [#allocation3], 16 }
   0xd   :  { %1877 = vsyncadd [#allocation3], 4294967280 }
   0xe   :  { %16 = sfence }
   0xf   :  { %17 = vsyncpa [#allocation6], 0 }
  0x10   :  { %18 = vsyncpa [#allocation8], 0  ;;  %s1883_s26 = smov [#allocation7]   ;;  %s1810_s29 = scalar_lea.hbm %s2120_s3, 9216 }
  0x11   :  { %s38_s27 = sshll.u32 %s1883_s26, 4  ;;  %p1811_p5 = scmp.ne.s32.totalorder %s2120_s3, %s1810_s29  ;;  %s39_s27 = int_to_ptr.vmem [resolvable:$true] %s38_s27 }
  0x12   :  { %p1814_p6 = scmp.lt.u32.totalorder %s1810_s29, %s2120_s3 }
  0x14   :  { %p1816_p7 = pnand %p1814_p6, %p1811_p5 }
  0x16   :  { %1819 = shalt.err (!%p1816_p7)
}
  0x17   :  { %s1820_s10 = scalar_lea.vmem %s39_s27, 9216  ;;  %p1825_p9 = scmp.lt.s32.totalorder %s39_s27, %s39_s27 }
  0x18   :  { %p1821_p8 = scmp.ne.s32.totalorder %s39_s27, %s1820_s10  ;;  %p1826_p10 = scmp.lt.s32.totalorder %s1820_s10, %s1820_s10 }
  0x1a   :  { %p1827_p11 = por %p1826_p10, %p1825_p9 }
  0x1c   :  { %p1828_p12 = pnand %p1827_p11, %p1821_p8 }
  0x1e   :  { %1831 = shalt.err (!%p1828_p12)
}
  0x1f   :  { %s1884_s11 = smov 576   ;;  %s1885_s12 = smov 36  }
  0x20   :  { %44 = dma.hbm_to_vmem [thread:$0]  %s2120_s3, 9216, %s39_s27, [#allocation8], %s1884_s11, %s1884_s11, %s1885_s12  }
  0x21   :  { %s1886_s15 = smov [#allocation5]   ;;  %s1832_s19 = scalar_lea.hbm %s2119_s2, 512 }
  0x22   :  { %s26_s16 = sshll.u32 %s1886_s15, 4  ;;  %p1833_p13 = scmp.ne.s32.totalorder %s2119_s2, %s1832_s19  ;;  %s27_s16 = int_to_ptr.vmem [resolvable:$true] %s26_s16 }
  0x23   :  { %p1836_p0 = scmp.lt.u32.totalorder %s1832_s19, %s2119_s2 }
  0x25   :  { %p1838_p1 = pnand %p1836_p0, %p1833_p13 }
  0x27   :  { %1841 = shalt.err (!%p1838_p1)
}
  0x28   :  { %s1842_s24 = scalar_lea.vmem %s27_s16, 512  ;;  %p1847_p3 = scmp.lt.s32.totalorder %s27_s16, %s27_s16 }
  0x29   :  { %p1843_p2 = scmp.ne.s32.totalorder %s27_s16, %s1842_s24  ;;  %p1848_p4 = scmp.lt.s32.totalorder %s1842_s24, %s1842_s24 }
  0x2b   :  { %p1849_p5 = por %p1848_p4, %p1847_p3 }
  0x2d   :  { %p1850_p6 = pnand %p1849_p5, %p1843_p2 }
  0x2f   :  { %1853 = shalt.err (!%p1850_p6)
}
  0x30   :  { %s1887_s3 = smov 128   ;;  %s1888_s25 = smov 8  }
  0x31   :  { %32 = dma.hbm_to_vmem [thread:$0]  %s2119_s2, 512, %s27_s16, [#allocation6], %s1887_s3, %s1887_s3, %s1888_s25  }
  0x32   :  { %s1889_s28 = smov [#allocation9]   ;;  %s1854_s7 = scalar_lea.hbm %s2121_s4, 2048 }
  0x33   :  { %s50_s0 = sshll.u32 %s1889_s28, 4  ;;  %p1855_p7 = scmp.ne.s32.totalorder %s2121_s4, %s1854_s7  ;;  %s51_s0 = int_to_ptr.vmem [resolvable:$true] %s50_s0 }
  0x34   :  { %p1858_p8 = scmp.lt.u32.totalorder %s1854_s7, %s2121_s4 }
  0x36   :  { %p1860_p9 = pnand %p1858_p8, %p1855_p7 }
  0x38   :  { %1863 = shalt.err (!%p1860_p9)
}
  0x39   :  { %s1864_s12 = scalar_lea.vmem %s51_s0, 2048  ;;  %p1869_p11 = scmp.lt.s32.totalorder %s51_s0, %s51_s0 }
  0x3a   :  { %p1865_p10 = scmp.ne.s32.totalorder %s51_s0, %s1864_s12  ;;  %p1870_p12 = scmp.lt.s32.totalorder %s1864_s12, %s1864_s12 }
  0x3c   :  { %p1871_p13 = por %p1870_p12, %p1869_p11 }
  0x3e   :  { %p1872_p0 = pnand %p1871_p13, %p1865_p10 }
  0x40   :  { %1875 = shalt.err (!%p1872_p0)
}
  0x41   :  { %s1890_s2 = smov 64   ;;  %s1891_s13 = smov 4  }
  0x42   :  { %56 = dma.hbm_to_vmem [thread:$0]  %s2121_s4, 2048, %s51_s0, [#allocation8], %s1890_s2, %s1890_s2, %s1891_s13  }
  0x43   :  { %1878 = dma.done.wait [#allocation6], 512  }
  0x44   :  { %1879 = vsyncadd [#allocation6], 4294966784 }
  0x45   :  { %1880 = dma.done.wait [#allocation8], 11264  }
  0x46   :  { %1881 = vsyncadd [#allocation8], 4294956032  ;;  %s69_s16 = sld [smem:[#allocation4]]  ;;  %s1400_s17 = sld [smem:[#allocation4 + $0x1]]  ;;  %v135_v12 = vld [vmem:[#allocation5 + $0x10] sm:$0xff]  ;;  %v136_v19 = vld [vmem:[#allocation5 + $0x18] sm:$0xff] }
  0x47   :  { %s1401_s18 = sld [smem:[#allocation4 + $0x2]]  ;;  %s1402_s19 = sld [smem:[#allocation4 + $0x3]]  ;;  %v1658_v22 = vld [vmem:[#allocation7 + $0x4] ss:$36 sps:$4 sm:$0xff]   ;;  %v1892_v24 = vmov 0.0   ;;  %v1893_v50 = vmov 0  }
  0x48   :  { %s1403_s20 = sld [smem:[#allocation4 + $0x4]]  ;;  %s1404_s21 = sld [smem:[#allocation4 + $0x5]]  ;;  %v1660_v23 = vld [vmem:[#allocation7] ss:$36 sps:$4 sm:$0xff]   ;;  %1573 = vmatprep.subr.bf16.mxu1 %v1892_v24  ;;  %v1661_v25 = vld [vmem:[#allocation7 + $0x8] ss:$36 sps:$4 sm:$0xff]   ;;  %337 = vmatprep.subr.bf16.mxu0 %v1658_v22 }
  0x49   :  { %s1405_s22 = sld [smem:[#allocation4 + $0x6]]  ;;  %s1406_s23 = sld [smem:[#allocation4 + $0x7]]  ;;  %v1662_v26 = vld [vmem:[#allocation7 + $0x4c] ss:$36 sps:$4 sm:$0xff]   ;;  %338 = vmatpush1.bf16.msra.mxu0 %v1660_v23  ;;  %1574 = vmatpush3.bf16.msra.mxu1 %v1661_v25  ;;  %v1666_v37 = vld [vmem:[#allocation7 + $0x94] ss:$36 sps:$4 sm:$0xff]  }
  0x4a   :  { %s1969_s24 = sld [smem:[#allocation4 + $0x8]]  ;;  %s1971_s3 = sld [smem:[#allocation4 + $0x9]]  ;;  %339 = vmatprep.subr.bf16.mxu0 %v1662_v26  ;;  %1575 = vmatprep.subr.bf16.mxu1 %v1892_v24  ;;  %v1664_v35 = vld [vmem:[#allocation7 + $0x48] ss:$36 sps:$4 sm:$0xff]   ;;  %v1665_v36 = vld [vmem:[#allocation7 + $0x50] ss:$36 sps:$4 sm:$0xff]  }
  0x4b   :  { %s1973_s25 = sld [smem:[#allocation4 + $0xa]]  ;;  %s1975_s26 = sld [smem:[#allocation4 + $0xb]]  ;;  %v1668_v38 = vld [vmem:[#allocation7 + $0x90] ss:$36 sps:$4 sm:$0xff]   ;;  %v1669_v39 = vld [vmem:[#allocation7 + $0x98] ss:$36 sps:$4 sm:$0xff]   ;;  %369 = vmatprep.mubr.bf16.mxu0 %v1893_v50 }
  0x4c   :  { %s70_s28 = scalar_lea.vmem %s2122_s5, %s69_s16  ;;  %s74_s30 = scalar_lea.vmem %s2122_s5, %s1400_s17  ;;  %v1670_v40 = vld [vmem:[#allocation7 + $0xdc] ss:$36 sps:$4 sm:$0xff]   ;;  %v1674_v43 = vld [vmem:[#allocation7 + $0x124] ss:$36 sps:$4 sm:$0xff]   ;;  %v1678_v46 = vld [vmem:[#allocation7 + $0x16c] ss:$36 sps:$4 sm:$0xff]  }
  0x4d   :  { %v71_v0 = vld [vmem:[%s70_s28] sm:$0x1]  ;;  %s78_s9 = scalar_lea.vmem %s2122_s5, %s1401_s18  ;;  %s82_s12 = scalar_lea.vmem %s2122_s5, %s1402_s19  ;;  %340 = vmatpush1.bf16.msra.mxu0 %v1664_v35  ;;  %1576 = vmatpush3.bf16.msra.mxu1 %v1665_v36  ;;  %v1672_v41 = vld [vmem:[#allocation7 + $0xd8] ss:$36 sps:$4 sm:$0xff]   ;;  %v1673_v42 = vld [vmem:[#allocation7 + $0xe0] ss:$36 sps:$4 sm:$0xff]  }
  0x4e   :  { %v75_v1 = vld [vmem:[%s74_s30] sm:$0x1]  ;;  %72 = vst [vmem:[#allocation2] sm:$0x1] %v71_v0  ;;  %s86_s14 = scalar_lea.vmem %s2122_s5, %s1403_s20  ;;  %s90_s17 = scalar_lea.vmem %s2122_s5, %s1404_s21  ;;  %341 = vmatprep.subr.bf16.mxu0 %v1666_v37  ;;  %1577 = vmatprep.subr.bf16.mxu1 %v1892_v24  ;;  %v1676_v44 = vld [vmem:[#allocation7 + $0x120] ss:$36 sps:$4 sm:$0xff]  }
  0x4f   :  { %76 = vst [vmem:[#allocation2 + $0x1] sm:$0x1] %v75_v1  ;;  %v79_v2 = vld [vmem:[%s78_s9] sm:$0x1]  ;;  %s94_s4 = scalar_lea.vmem %s2122_s5, %s1405_s22  ;;  %s98_s0 = scalar_lea.vmem %s2122_s5, %s1406_s23  ;;  %v1677_v45 = vld [vmem:[#allocation7 + $0x128] ss:$36 sps:$4 sm:$0xff]  }
  0x50   :  { %v83_v3 = vld [vmem:[%s82_s12] sm:$0x1]  ;;  %80 = vst [vmem:[#allocation2 + $0x2] sm:$0x1] %v79_v2  ;;  %s102_s29 = scalar_lea.vmem %s2122_s5, %s1969_s24  ;;  %s106_s8 = scalar_lea.vmem %s2122_s5, %s1971_s3  ;;  %v1680_v47 = vld [vmem:[#allocation7 + $0x168] ss:$36 sps:$4 sm:$0xff]  }
  0x51   :  { %84 = vst [vmem:[#allocation2 + $0x3] sm:$0x1] %v83_v3  ;;  %v87_v4 = vld [vmem:[%s86_s14] sm:$0x1]  ;;  %s110_s23 = scalar_lea.vmem %s2122_s5, %s1973_s25  ;;  %s114_s12 = scalar_lea.vmem %s2122_s5, %s1975_s26  ;;  %342 = vmatpush1.bf16.msra.mxu0 %v1668_v38  ;;  %1578 = vmatpush3.bf16.msra.mxu1 %v1669_v39  ;;  %v1682_v49 = vld [vmem:[#allocation7 + $0x1b4] ss:$36 sps:$4 sm:$0xff]  }
  0x52   :  { %v91_v5 = vld [vmem:[%s90_s17] sm:$0x1]  ;;  %88 = vst [vmem:[#allocation2 + $0x4] sm:$0x1] %v87_v4  ;;  %s1411_s24 = sld [smem:[#allocation4 + $0xc]]  ;;  %s1412_s3 = sld [smem:[#allocation4 + $0xd]]  ;;  %1579 = vmatprep.subr.bf16.mxu1 %v1892_v24  ;;  %343 = vmatprep.subr.bf16.mxu0 %v1670_v40 }
  0x53   :  { %92 = vst [vmem:[#allocation2 + $0x5] sm:$0x1] %v91_v5  ;;  %v95_v6 = vld [vmem:[%s94_s4] sm:$0x1]  ;;  %s1413_s2 = sld [smem:[#allocation4 + $0xe]]  ;;  %s1414_s13 = sld [smem:[#allocation4 + $0xf]] }
  0x54   :  { %v99_v7 = vld [vmem:[%s98_s0] sm:$0x1]  ;;  %96 = vst [vmem:[#allocation2 + $0x6] sm:$0x1] %v95_v6  ;;  %vm1894_vm0 = vmmov 0   ;;  %vm489_vm1 = vcmask 130048  }
  0x55   :  { %100 = vst [vmem:[#allocation2 + $0x7] sm:$0x1] %v99_v7  ;;  %v103_v8 = vld [vmem:[%s102_s29] sm:$0x1]  ;;  %344 = vmatpush1.bf16.msra.mxu0 %v1672_v41  ;;  %1580 = vmatpush3.bf16.msra.mxu1 %v1673_v42  ;;  %v1685_v52 = vld [vmem:[#allocation7 + $0x1b8] ss:$36 sps:$4 sm:$0xff]  }
  0x56   :  { %v107_v9 = vld [vmem:[%s106_s8] sm:$0x1]  ;;  %104 = vst [vmem:[#allocation2 + $0x8] sm:$0x1] %v103_v8  ;;  %1581 = vmatprep.subr.bf16.mxu1 %v1892_v24  ;;  %345 = vmatprep.subr.bf16.mxu0 %v1674_v43  ;;  %v1686_v53 = vld [vmem:[#allocation7 + $0x1fc] ss:$36 sps:$4 sm:$0xff]  }
  0x57   :  { %108 = vst [vmem:[#allocation2 + $0x9] sm:$0x1] %v107_v9  ;;  %v111_v10 = vld [vmem:[%s110_s23] sm:$0x1]  ;;  %1589 = vmatprep.mubr.msk.bf16.mxu1 %vm1894_vm0, %v1892_v24  ;;  %v1688_v54 = vld [vmem:[#allocation7 + $0x1f8] ss:$36 sps:$4 sm:$0xff]  }
  0x58   :  { %v115_v11 = vld [vmem:[%s114_s12] sm:$0x1]  ;;  %112 = vst [vmem:[#allocation2 + $0xa] sm:$0x1] %v111_v10  ;;  %s118_s25 = scalar_lea.vmem %s2122_s5, %s1411_s24  ;;  %s122_s17 = scalar_lea.vmem %s2122_s5, %s1412_s3  ;;  %v1689_v55 = vld [vmem:[#allocation7 + $0x200] ss:$36 sps:$4 sm:$0xff]  }
  0x59   :  { %116 = vst [vmem:[#allocation2 + $0xb] sm:$0x1] %v115_v11  ;;  %v119_v15 = vld [vmem:[%s118_s25] sm:$0x1]  ;;  %s126_s4 = scalar_lea.vmem %s2122_s5, %s1413_s2  ;;  %s130_s0 = scalar_lea.vmem %s2122_s5, %s1414_s13  ;;  %346 = vmatpush1.bf16.msra.mxu0 %v1676_v44  ;;  %1582 = vmatpush3.bf16.msra.mxu1 %v1677_v45  ;;  %v1415_v0 = vld [vmem:[#allocation5] ss:$0 sm:$0xff] }
  0x5a   :  { %120 = vst [vmem:[#allocation2 + $0xc] sm:$0x1] %v119_v15  ;;  %v123_v16 = vld [vmem:[%s122_s17] sm:$0x1]  ;;  %347 = vmatprep.subr.bf16.mxu0 %v1678_v46  ;;  %1583 = vmatprep.subr.bf16.mxu1 %v1892_v24  ;;  %v1416_v4 = vld [vmem:[#allocation5 + $0x1] ss:$0 sm:$0xff] }
  0x5b   :  { %v127_v17 = vld [vmem:[%s126_s4] sm:$0x1]  ;;  %124 = vst [vmem:[#allocation2 + $0xd] sm:$0x1] %v123_v16  ;;  %v1441_v9 = vld [vmem:[#allocation5 + $0x2] ss:$0 sm:$0xff] }
  0x5c   :  { %v133_v13 = vld [vmem:[#allocation2] sm:$0xff]  ;;  %128 = vst [vmem:[#allocation2 + $0xe] sm:$0x1] %v127_v17  ;;  %v1442_v15 = vld [vmem:[#allocation5 + $0x3] ss:$0 sm:$0xff] }
  0x5d   :  { %v137_v14 = vadd.f32 %v135_v12, %v133_v13  ;;  %v131_v18 = vld [vmem:[%s130_s0] sm:$0x1]  ;;  %348 = vmatpush1.bf16.msra.mxu0 %v1680_v47  ;;  %v1443_v12 = vld [vmem:[#allocation5 + $0x4] ss:$0 sm:$0xff] }
  0x5e   :  { %132 = vst [vmem:[#allocation2 + $0xf] sm:$0x1] %v131_v18  ;;  %v1681_v48 = vld [vmem:[#allocation7 + $0x170] ss:$36 sps:$4 sm:$0xff]   ;;  %349 = vmatprep.subr.bf16.mxu0 %v1682_v49 }
  0x5f   :  { %139 = vadd.xlane.f32.xlu0 %v137_v14  ;;  %1584 = vmatpush3.bf16.msra.mxu1 %v1681_v48  ;;  %v1684_v51 = vld [vmem:[#allocation7 + $0x1b0] ss:$36 sps:$4 sm:$0xff]  }
  0x60   :  { %1585 = vmatprep.subr.bf16.mxu1 %v1892_v24 }
  0x61   :  { %350 = vmatpush1.bf16.msra.mxu0 %v1684_v51 }
  0x62   :  { %351 = vmatprep.subr.bf16.mxu0 %v1686_v53  ;;  %v1690_v53 = vld [vmem:[#allocation7 + $0xc] ss:$36 sps:$4 sm:$0xff]  }
  0x63   :  { %1586 = vmatpush3.bf16.msra.mxu1 %v1685_v52 }
  0x64   :  { %1587 = vmatprep.subr.bf16.mxu1 %v1892_v24 }
  0x65   :  { %v134_v20 = vld [vmem:[#allocation2 + $0x8] sm:$0xff]  ;;  %352 = vmatpush1.bf16.msra.mxu0 %v1688_v54 }
  0x66   :  { %v138_v21 = vadd.f32 %v136_v19, %v134_v20  ;;  %1605 = vmatprep.subr.bf16.mxu0 %v1892_v24  ;;  %v1691_v54 = vld [vmem:[#allocation7 + $0x54] ss:$36 sps:$4 sm:$0xff]  }
  0x67   :  { %1588 = vmatpush3.bf16.msra.mxu1 %v1689_v55  ;;  %v1692_v55 = vld [vmem:[#allocation7 + $0x9c] ss:$36 sps:$4 sm:$0xff]  }
  0x68   :  { %141 = vadd.xlane.f32.xlu0 %v138_v21  ;;  %1593 = vmatprep.subr.bf16.mxu1 %v1892_v24 }
  0xec   :  { %v140_v27 = vpop.xlane.xlu0 %139 }
  0xed   :  { %v144_v28 = vmul.f32 0.0078125, %v140_v27 }
  0xef   :  { %v2031_v29 = vsub.f32 %v137_v14, %v144_v28 }
  0xf1   :  { %v148_v30 = vmul.f32 %v2031_v29, %v2031_v29 }
  0xf3   :  { %150 = vadd.xlane.f32.xlu1 %v148_v30 }
  0xf5   :  { %v142_v31 = vpop.xlane.xlu0 %141 }
  0xf6   :  { %v145_v32 = vmul.f32 0.0078125, %v142_v31 }
  0xf8   :  { %v2035_v33 = vsub.f32 %v138_v21, %v145_v32  ;;  %v446_v32 = vld [vmem:[%s2118_s1] sm:$0xff] }
  0xfa   :  { %v149_v34 = vmul.f32 %v2035_v33, %v2035_v33 }
  0xfc   :  { %152 = vadd.xlane.f32.xlu1 %v149_v34  ;;  %v447_v34 = vld [vmem:[%s2118_s1 + $0x8] sm:$0xff] }
 0x180   :  { %v151_v56 = vpop.xlane.xlu1 %150 }
 0x181   :  { %v154_v57 = vmul.f32 0.0078125, %v151_v56  ;;  %v1693_v56 = vld [vmem:[#allocation7 + $0xe4] ss:$36 sps:$4 sm:$0xff]  }
 0x183   :  { %v156_v58 = vadd.f32 1e-12, %v154_v57  ;;  %v1694_v57 = vld [vmem:[#allocation7 + $0x12c] ss:$36 sps:$4 sm:$0xff]  }
 0x185   :  { %1770 = vrsqrt.f32 %v156_v58  ;;  %v1695_v58 = vld [vmem:[#allocation7 + $0x174] ss:$36 sps:$4 sm:$0xff]  }
 0x189   :  { %v153_v59 = vpop.xlane.xlu1 %152 }
 0x18a   :  { %v155_v60 = vmul.f32 0.0078125, %v153_v59  ;;  %v1696_v59 = vld [vmem:[#allocation7 + $0x1bc] ss:$36 sps:$4 sm:$0xff]  }
 0x18c   :  { %v157_v61 = vadd.f32 1e-12, %v155_v60 }
 0x18e   :  { %1772 = vrsqrt.f32 %v157_v61 }
 0x18f   :  { %v1771_v62 = vpop.eup %1770 }
 0x190   :  { %v160_v63 = vmul.f32 %v1771_v62, %v2031_v29 }
 0x192   :  { %v167_v3 = vmul.f32 %v1415_v0, %v160_v63 }
 0x194   :  { %v2052_v6 = vadd.f32 %v1416_v4, %v167_v3  ;;  %v1697_v3 = vld [vmem:[#allocation7 + $0x204] ss:$36 sps:$4 sm:$0xff]  }
 0x198   :  { %v1773_v1 = vpop.eup %1772 }
 0x199   :  { %v161_v2 = vmul.f32 %v1773_v1, %v2035_v33 }
 0x19b   :  { %v168_v5 = vmul.f32 %v1415_v0, %v161_v2 }
 0x19d   :  { %v2054_v7 = vadd.f32 %v1416_v4, %v168_v5 }
 0x19f   :  { %v176_v8 = vpack.c.bf16 %v2054_v7, %v2052_v6 }
 0x1a1   :  { %370 = vmatmul.mubr.bf16.vlgmr.msra.gmra.mrb[0].mxu0 %v176_v8  ;;  %1590 = vmatmul.mubr.bf16.vlgmr.msra.gmra.mrb[0].mxu1 %v176_v8 }
 0x1a2   :  { %1595 = vmatprep.mubr.msk.bf16.mxu1 %vm1894_vm0, %v1892_v24  ;;  %1621 = vmatprep.mubr.msk.bf16.mxu0 %vm1894_vm0, %v1892_v24 }
 0x1a3   :  { %1606 = vmatpush3.bf16.msra.mxu0 %v1690_v53 }
 0x1a4   :  { %1607 = vmatprep.subr.bf16.mxu0 %v1892_v24 }
 0x1a7   :  { %1608 = vmatpush3.bf16.msra.mxu0 %v1691_v54 }
 0x1a8   :  { %1609 = vmatprep.subr.bf16.mxu0 %v1892_v24 }
 0x1ab   :  { %1610 = vmatpush3.bf16.msra.mxu0 %v1692_v55 }
 0x1ac   :  { %1611 = vmatprep.subr.bf16.mxu0 %v1892_v24 }
 0x1af   :  { %1612 = vmatpush3.bf16.msra.mxu0 %v1693_v56  ;;  %v1455_v56 = vld [vmem:[#allocation5 + $0x7] ss:$0 sm:$0xff] }
 0x1b0   :  { %1613 = vmatprep.subr.bf16.mxu0 %v1892_v24 }
 0x1b3   :  { %1614 = vmatpush3.bf16.msra.mxu0 %v1694_v57 }
 0x1b4   :  { %1615 = vmatprep.subr.bf16.mxu0 %v1892_v24 }
 0x1b7   :  { %1616 = vmatpush3.bf16.msra.mxu0 %v1695_v58 }
 0x1b8   :  { %1617 = vmatprep.subr.bf16.mxu0 %v1892_v24 }
 0x1bb   :  { %1618 = vmatpush3.bf16.msra.mxu0 %v1696_v59 }
 0x1bc   :  { %1619 = vmatprep.subr.bf16.mxu0 %v1892_v24 }
 0x1bf   :  { %1620 = vmatpush3.bf16.msra.mxu0 %v1697_v3  ;;  %v1728_v3 = vld [vmem:[#allocation9 + $0x58] sm:$0xff]  }
 0x274   :  { %v371_v10 = vpop.f32.mrb[0].mxu0  ;;  %v414_v11 = vpop.f32.mrb[0].mxu1 }
 0x275   :  { %v426_v13 = vadd.f32 %v1441_v9, %v371_v10  ;;  %v373_v14 = vpop.f32.mrb[1].mxu0  ;;  %v1591_v16 = vpop.f32.mrb[1].mxu1  ;;  %v442_v19 = vadd.f32 %v1443_v12, %v414_v11  ;;  %v1445_v11 = vld [vmem:[#allocation5 + $0x5] ss:$0 sm:$0xff] }
 0x276   :  { %v375_v17 = vpop.f32.mrb[2].mxu0  ;;  %v417_v18 = vpop.f32.mrb[2].mxu1  ;;  %v435_v25 = vadd.f32 %v1442_v15, %v373_v14 }
 0x277   :  { %v427_v20 = vadd.f32 %v1441_v9, %v375_v17  ;;  %v443_v21 = vadd.f32 %v1443_v12, %v417_v18  ;;  %v377_v22 = vpop.f32.mrb[3].mxu0  ;;  %v1592_v23 = vpop.f32.mrb[3].mxu1  ;;  %v428_v27 = vmul.f32 0.088388346, %v426_v13 }
 0x278   :  { %v436_v26 = vadd.f32 %v1442_v15, %v377_v22  ;;  %v1703_v22 = vld [vmem:[#allocation7 + $0x5c] ss:$36 sps:$4 sm:$0xff]  }
 0x279   :  { %v429_v28 = vmul.f32 0.088388346, %v427_v20  ;;  %v513_v29 = vpack.c.bf16 %v443_v21, %v442_v19  ;;  %v1698_v20 = vld [vmem:[#allocation7 + $0x10] ss:$36 sps:$4 sm:$0xff]   ;;  %v1701_v23 = vld [vmem:[#allocation7 + $0x58] ss:$36 sps:$4 sm:$0xff]  }
 0x27a   :  { %v445_v30 = vpack.c.bf16 %v436_v26, %v435_v25  ;;  %v1700_v21 = vld [vmem:[#allocation7 + $0x14] ss:$36 sps:$4 sm:$0xff]  }
 0x27b   :  { %v444_v31 = vpack.c.bf16 %v429_v28, %v428_v27 }
 0x27c   :  { %1594 = vmatpush3.bf16.xpose.msra.mxu1 %v445_v30 }
 0x27d   :  { %1599 = vmatprep.subr.bf16.mxu1 %v1892_v24 }
 0x283   :  { %1596 = vmatmul.mubr.bf16.vlgmr.msra.gmra.mrb[4].mxu1 %v444_v31 }
 0x284   :  { %1600 = vmatpush3.bf16.msra.mxu1 %v513_v29  ;;  %1601 = vmatprep.mubr.msk.bf16.mxu1 %vm1894_vm0, %v1892_v24 }
 0x285   :  { %814 = vmatprep.subr.bf16.mxu1 %v1700_v21 }
 0x356   :  { %v482_v33 = vpop.f32.mrb[4].mxu1 }
 0x357   :  { %v483_v35 = vadd.f32 %v482_v33, %v446_v32  ;;  %v1597_v36 = vpop.f32.mrb[5].mxu1  ;;  %v1704_v32 = vld [vmem:[#allocation7 + $0xa0] ss:$36 sps:$4 sm:$0xff]   ;;  %v1709_v33 = vld [vmem:[#allocation7 + $0xec] ss:$36 sps:$4 sm:$0xff]  }
 0x358   :  { %v485_v37 = vpop.f32.mrb[6].mxu1  ;;  %v1710_v36 = vld [vmem:[#allocation7 + $0x130] ss:$36 sps:$4 sm:$0xff]  }
 0x359   :  { %v486_v38 = vadd.f32 %v485_v37, %v447_v34  ;;  %v1598_v39 = vpop.f32.mrb[7].mxu1  ;;  %v490_v40 = vsel %vm489_vm1, %v483_v35, -inf  ;;  %v1707_v34 = vld [vmem:[#allocation7 + $0xe8] ss:$36 sps:$4 sm:$0xff]   ;;  %v1715_v37 = vld [vmem:[#allocation7 + $0x17c] ss:$36 sps:$4 sm:$0xff]  }
 0x35a   :  { %491 = vmax.xlane.f32.xlu0 %v490_v40  ;;  %v1718_v39 = vld [vmem:[#allocation7 + $0x1c4] ss:$36 sps:$4 sm:$0xff]  }
 0x35b   :  { %v493_v41 = vsel %vm489_vm1, %v486_v38, -inf  ;;  %v1716_v40 = vld [vmem:[#allocation7 + $0x1c0] ss:$36 sps:$4 sm:$0xff]  }
 0x35c   :  { %494 = vmax.xlane.f32.xlu1 %v493_v41  ;;  %v1721_v41 = vld [vmem:[#allocation7 + $0x20c] ss:$36 sps:$4 sm:$0xff]  }
 0x3e7   :  { %v492_v42 = vpop.xlane.xlu0 %491 }
 0x3e8   :  { %v496_v43 = vsub.f32 %v483_v35, %v492_v42  ;;  %v1712_v35 = vld [vmem:[#allocation7 + $0x134] ss:$36 sps:$4 sm:$0xff]   ;;  %v1719_v42 = vld [vmem:[#allocation7 + $0x208] ss:$36 sps:$4 sm:$0xff]  }
 0x3e9   :  { %v495_v44 = vpop.xlane.xlu1 %494 }
 0x3ea   :  { %v498_v45 = vmul.f32 1.442695, %v496_v43  ;;  %v497_v46 = vsub.f32 %v486_v38, %v495_v44  ;;  %v1713_v38 = vld [vmem:[#allocation7 + $0x178] ss:$36 sps:$4 sm:$0xff]  }
 0x3ec   :  { %1774 = vpow2.f32 %v498_v45  ;;  %v500_v47 = vmul.f32 1.442695, %v497_v46 }
 0x3ee   :  { %1776 = vpow2.f32 %v500_v47 }
 0x3f6   :  { %v1775_v48 = vpop.eup %1774 }
 0x3f7   :  { %v502_v49 = vsel %vm489_vm1, %v1775_v48, 0.0 }
 0x3f8   :  { %v1777_v51 = vpop.eup %1776  ;;  %503 = vadd.xlane.f32.xlu0 %v502_v49 }
 0x3f9   :  { %v505_v52 = vsel %vm489_vm1, %v1777_v51, 0.0 }
 0x3fa   :  { %506 = vadd.xlane.f32.xlu1 %v505_v52 }
 0x485   :  { %v504_v60 = vpop.xlane.xlu0 %503 }
 0x486   :  { %1778 = vrcp.f32 %v504_v60 }
 0x487   :  { %v507_v61 = vpop.xlane.xlu1 %506 }
 0x488   :  { %1780 = vrcp.f32 %v507_v61  ;;  %v1722_v61 = vld [vmem:[#allocation9 + $0x40] sm:$0xff]  }
 0x489   :  { %1542 = vmatprep.subr.bf16.mxu0 %v1722_v61 }
 0x490   :  { %v1779_v62 = vpop.eup %1778 }
 0x491   :  { %v509_v0 = vmul.f32 %v1779_v62, %v1775_v48  ;;  %v1723_v62 = vld [vmem:[#allocation9] sm:$0xff]  }
 0x492   :  { %v1781_v63 = vpop.eup %1780 }
 0x493   :  { %v511_v1 = vmul.f32 %v1781_v63, %v1777_v51  ;;  %v1454_v51 = vld [vmem:[#allocation5 + $0x6] ss:$0 sm:$0xff]  ;;  %v1724_v63 = vld [vmem:[#allocation9 + $0x48] sm:$0xff]  }
 0x495   :  { %v512_v2 = vpack.c.bf16 %v511_v1, %v509_v0  ;;  %v1725_v0 = vld [vmem:[#allocation9 + $0x8] sm:$0xff]   ;;  %v1726_v1 = vld [vmem:[#allocation9 + $0x50] sm:$0xff]  }
 0x497   :  { %1602 = vmatmul.mubr.msk.bf16.vlgmr.msra.gmra.mrb[8].mxu1 %vm489_vm1, %v512_v2  ;;  %v1727_v2 = vld [vmem:[#allocation9 + $0x10] sm:$0xff]  }
 0x498   :  { %846 = vmatprep.mubr.bf16.mxu1 %v1893_v50  ;;  %815 = vmatpush1.bf16.msra.mxu1 %v1698_v20 }
 0x499   :  { %816 = vmatprep.subr.bf16.mxu1 %v1703_v22 }
 0x49c   :  { %817 = vmatpush1.bf16.msra.mxu1 %v1701_v23 }
 0x56a   :  { %v551_v4 = vpop.f32.mrb[8].mxu1 }
 0x56b   :  { %v1603_v5 = vpop.f32.mrb[9].mxu1 }
 0x56c   :  { %v554_v8 = vpop.f32.mrb[10].mxu1  ;;  %v1730_v5 = vld [vmem:[#allocation9 + $0x60] sm:$0xff]  }
 0x56d   :  { %v558_v9 = vpack.c.bf16 %v554_v8, %v551_v4  ;;  %v1604_v10 = vpop.f32.mrb[11].mxu1  ;;  %v1729_v4 = vld [vmem:[#allocation9 + $0x18] sm:$0xff]   ;;  %v1731_v8 = vld [vmem:[#allocation9 + $0x20] sm:$0xff]  }
 0x56e   :  { %v1734_v10 = vld [vmem:[#allocation9 + $0x70] sm:$0xff]  }
 0x56f   :  { %1622 = vmatmul.mubr.bf16.vlgmr.msra.gmra.mrb[4].mxu0 %v558_v9  ;;  %v1733_v9 = vld [vmem:[#allocation9 + $0x28] sm:$0xff]  }
 0x570   :  { %1543 = vmatpush3.bf16.msra.mxu0 %v1723_v62 }
 0x571   :  { %1544 = vmatprep.subr.bf16.mxu0 %v1724_v63 }
 0x574   :  { %1545 = vmatpush3.bf16.msra.mxu0 %v1725_v0 }
 0x575   :  { %1546 = vmatprep.subr.bf16.mxu0 %v1726_v1  ;;  %v1474_v1 = vld [vmem:[#allocation5 + $0xa] ss:$0 sm:$0xff] }
 0x578   :  { %1547 = vmatpush3.bf16.msra.mxu0 %v1727_v2 }
 0x579   :  { %1548 = vmatprep.subr.bf16.mxu0 %v1728_v3 }
 0x57c   :  { %1549 = vmatpush3.bf16.msra.mxu0 %v1729_v4 }
 0x57d   :  { %1550 = vmatprep.subr.bf16.mxu0 %v1730_v5 }
 0x580   :  { %1551 = vmatpush3.bf16.msra.mxu0 %v1731_v8 }
 0x642   :  { %v662_v12 = vpop.f32.mrb[4].mxu0 }
 0x643   :  { %v663_v13 = vadd.f32 %v1445_v11, %v662_v12  ;;  %v1623_v14 = vpop.f32.mrb[5].mxu0  ;;  %v1736_v12 = vld [vmem:[#allocation9 + $0x78] sm:$0xff]  }
 0x644   :  { %v665_v15 = vpop.f32.mrb[6].mxu0  ;;  %v1456_v14 = vld [vmem:[#allocation5 + $0x8] ss:$0 sm:$0xff] }
 0x645   :  { %v666_v16 = vadd.f32 %v1445_v11, %v665_v15  ;;  %v1624_v17 = vpop.f32.mrb[7].mxu0  ;;  %v669_v18 = vadd.f32 %v663_v13, %v2052_v6  ;;  %v1735_v11 = vld [vmem:[#allocation9 + $0x30] sm:$0xff]   ;;  %v1737_v13 = vld [vmem:[#allocation9 + $0x38] sm:$0xff]   ;;  %v1457_v15 = vld [vmem:[#allocation5 + $0x9] ss:$0 sm:$0xff] }
 0x647   :  { %671 = vadd.xlane.f32.xlu0 %v669_v18  ;;  %v670_v19 = vadd.f32 %v666_v16, %v2054_v7  ;;  %v1706_v7 = vld [vmem:[#allocation7 + $0xa4] ss:$36 sps:$4 sm:$0xff]  }
 0x648   :  { %818 = vmatprep.subr.bf16.mxu1 %v1706_v7 }
 0x649   :  { %673 = vadd.xlane.f32.xlu1 %v670_v19  ;;  %819 = vmatpush1.bf16.msra.mxu1 %v1704_v32 }
 0x64a   :  { %820 = vmatprep.subr.bf16.mxu1 %v1709_v33 }
 0x64d   :  { %821 = vmatpush1.bf16.msra.mxu1 %v1707_v34 }
 0x64e   :  { %822 = vmatprep.subr.bf16.mxu1 %v1712_v35 }
 0x651   :  { %823 = vmatpush1.bf16.msra.mxu1 %v1710_v36 }
 0x652   :  { %824 = vmatprep.subr.bf16.mxu1 %v1715_v37 }
 0x655   :  { %825 = vmatpush1.bf16.msra.mxu1 %v1713_v38 }
 0x656   :  { %826 = vmatprep.subr.bf16.mxu1 %v1718_v39 }
 0x659   :  { %827 = vmatpush1.bf16.msra.mxu1 %v1716_v40 }
 0x65a   :  { %828 = vmatprep.subr.bf16.mxu1 %v1721_v41 }
 0x65d   :  { %829 = vmatpush1.bf16.msra.mxu1 %v1719_v42 }
 0x6d4   :  { %v672_v25 = vpop.xlane.xlu0 %671 }
 0x6d5   :  { %v675_v26 = vmul.f32 0.0078125, %v672_v25 }
 0x6d6   :  { %v674_v27 = vpop.xlane.xlu1 %673 }
 0x6d7   :  { %v677_v28 = vsub.f32 %v669_v18, %v675_v26  ;;  %v676_v29 = vmul.f32 0.0078125, %v674_v27 }
 0x6d9   :  { %v678_v30 = vsub.f32 %v670_v19, %v676_v29  ;;  %v679_v31 = vmul.f32 %v677_v28, %v677_v28 }
 0x6db   :  { %681 = vadd.xlane.f32.xlu0 %v679_v31  ;;  %v680_v6 = vmul.f32 %v678_v30, %v678_v30 }
 0x6dd   :  { %683 = vadd.xlane.f32.xlu1 %v680_v6 }
 0x768   :  { %v682_v43 = vpop.xlane.xlu0 %681 }
 0x769   :  { %v685_v44 = vmul.f32 0.0078125, %v682_v43 }
 0x76a   :  { %v684_v45 = vpop.xlane.xlu1 %683 }
 0x76b   :  { %v687_v46 = vadd.f32 1e-12, %v685_v44  ;;  %v686_v47 = vmul.f32 0.0078125, %v684_v45 }
 0x76d   :  { %1782 = vrsqrt.f32 %v687_v46  ;;  %v688_v48 = vadd.f32 1e-12, %v686_v47 }
 0x76f   :  { %1784 = vrsqrt.f32 %v688_v48 }
 0x777   :  { %v1783_v49 = vpop.eup %1782 }
 0x778   :  { %v691_v52 = vmul.f32 %v1783_v49, %v677_v28 }
 0x779   :  { %v1785_v53 = vpop.eup %1784 }
 0x77a   :  { %v692_v54 = vmul.f32 %v1785_v53, %v678_v30  ;;  %v698_v55 = vmul.f32 %v1454_v51, %v691_v52 }
 0x77c   :  { %v699_v57 = vmul.f32 %v1454_v51, %v692_v54  ;;  %v2086_v58 = vadd.f32 %v1455_v56, %v698_v55 }
 0x77e   :  { %v2088_v59 = vadd.f32 %v1455_v56, %v699_v57 }
 0x780   :  { %v707_v60 = vpack.c.bf16 %v2088_v59, %v2086_v58 }
 0x782   :  { %847 = vmatmul.mubr.bf16.vlgmr.msra.gmra.mrb[12].mxu1 %v707_v60 }
 0x783   :  { %1236 = vmatprep.mubr.bf16.mxu1 %v1893_v50  ;;  %v1732_v50 = vld [vmem:[#allocation9 + $0x68] sm:$0xff]  }
 0x784   :  { %1552 = vmatprep.subr.bf16.mxu0 %v1732_v50 }
 0x785   :  { %1553 = vmatpush3.bf16.msra.mxu0 %v1733_v9 }
 0x786   :  { %1554 = vmatprep.subr.bf16.mxu0 %v1734_v10 }
 0x789   :  { %1555 = vmatpush3.bf16.msra.mxu0 %v1735_v11 }
 0x78a   :  { %1556 = vmatprep.subr.bf16.mxu0 %v1736_v12  ;;  %v1738_v12 = vld [vmem:[#allocation7 + $0x18] ss:$36 sps:$4 sm:$0xff]  }
 0x78d   :  { %1557 = vmatpush3.bf16.msra.mxu0 %v1737_v13  ;;  %v1740_v13 = vld [vmem:[#allocation7 + $0x1c] ss:$36 sps:$4 sm:$0xff]  }
 0x78e   :  { %1625 = vmatprep.subr.bf16.mxu0 %v1892_v24  ;;  %1204 = vmatprep.subr.bf16.mxu1 %v1740_v13 }
 0x78f   :  { %1205 = vmatpush1.bf16.msra.mxu1 %v1738_v12 }
 0x855   :  { %v848_v16 = vpop.f32.mrb[12].mxu1 }
 0x856   :  { %v849_v17 = vadd.f32 %v1456_v14, %v848_v16  ;;  %v850_v18 = vpop.f32.mrb[13].mxu1 }
 0x857   :  { %v851_v19 = vadd.f32 %v1457_v15, %v850_v18  ;;  %v852_v20 = vpop.f32.mrb[14].mxu1 }
 0x858   :  { %v857_v21 = vmul.f32 %v849_v17, %v849_v17  ;;  %v853_v22 = vadd.f32 %v1456_v14, %v852_v20  ;;  %v854_v23 = vpop.f32.mrb[15].mxu1  ;;  %v1743_v14 = vld [vmem:[#allocation7 + $0x64] ss:$36 sps:$4 sm:$0xff]  }
 0x859   :  { %v858_v25 = vmul.f32 %v851_v19, %v851_v19  ;;  %v855_v26 = vadd.f32 %v1457_v15, %v854_v23  ;;  %v1741_v15 = vld [vmem:[#allocation7 + $0x60] ss:$36 sps:$4 sm:$0xff]   ;;  %1206 = vmatprep.subr.bf16.mxu1 %v1743_v14  ;;  %v1744_v23 = vld [vmem:[#allocation7 + $0xa8] ss:$36 sps:$4 sm:$0xff]  }
 0x85a   :  { %v861_v27 = vmul.f32 %v857_v21, %v849_v17  ;;  %v859_v28 = vmul.f32 %v853_v22, %v853_v22  ;;  %1207 = vmatpush1.bf16.msra.mxu1 %v1741_v15 }
 0x85b   :  { %v862_v29 = vmul.f32 %v858_v25, %v851_v19  ;;  %v860_v30 = vmul.f32 %v855_v26, %v855_v26  ;;  %v1749_v25 = vld [vmem:[#allocation7 + $0xf4] ss:$36 sps:$4 sm:$0xff]  }
 0x85c   :  { %v865_v31 = vmul.f32 0.044715, %v861_v27  ;;  %v863_v6 = vmul.f32 %v859_v28, %v853_v22  ;;  %v1752_v27 = vld [vmem:[#allocation7 + $0x13c] ss:$36 sps:$4 sm:$0xff]  }
 0x85d   :  { %v866_v7 = vmul.f32 0.044715, %v862_v29  ;;  %v864_v32 = vmul.f32 %v860_v30, %v855_v26  ;;  %v1750_v28 = vld [vmem:[#allocation7 + $0x138] ss:$36 sps:$4 sm:$0xff]   ;;  %v1755_v29 = vld [vmem:[#allocation7 + $0x184] ss:$36 sps:$4 sm:$0xff]  }
 0x85e   :  { %v869_v33 = vadd.f32 %v865_v31, %v849_v17  ;;  %v867_v34 = vmul.f32 0.044715, %v863_v6  ;;  %v1753_v30 = vld [vmem:[#allocation7 + $0x180] ss:$36 sps:$4 sm:$0xff]   ;;  %v1758_v31 = vld [vmem:[#allocation7 + $0x1cc] ss:$36 sps:$4 sm:$0xff]  }
 0x85f   :  { %v870_v35 = vadd.f32 %v866_v7, %v851_v19  ;;  %v868_v36 = vmul.f32 0.044715, %v864_v32  ;;  %v1756_v6 = vld [vmem:[#allocation7 + $0x1c8] ss:$36 sps:$4 sm:$0xff]   ;;  %v1761_v7 = vld [vmem:[#allocation7 + $0x214] ss:$36 sps:$4 sm:$0xff]  }
 0x860   :  { %v873_v37 = vmul.f32 0.7978846, %v869_v33  ;;  %v871_v38 = vadd.f32 %v867_v34, %v853_v22  ;;  %v1759_v32 = vld [vmem:[#allocation7 + $0x210] ss:$36 sps:$4 sm:$0xff]   ;;  %v1762_v33 = vld [vmem:[#allocation7 + $0x20] ss:$36 sps:$4 sm:$0xff]  }
 0x861   :  { %v874_v39 = vmul.f32 0.7978846, %v870_v35  ;;  %v872_v40 = vadd.f32 %v868_v36, %v855_v26  ;;  %v1763_v34 = vld [vmem:[#allocation7 + $0x68] ss:$36 sps:$4 sm:$0xff]   ;;  %v1764_v35 = vld [vmem:[#allocation7 + $0xb0] ss:$36 sps:$4 sm:$0xff]  }
 0x862   :  { %1786 = vtanh.f32 %v873_v37  ;;  %v875_v41 = vmul.f32 0.7978846, %v871_v38  ;;  %v1765_v36 = vld [vmem:[#allocation7 + $0xf8] ss:$36 sps:$4 sm:$0xff]   ;;  %v1766_v37 = vld [vmem:[#allocation7 + $0x140] ss:$36 sps:$4 sm:$0xff]  }
 0x863   :  { %1788 = vtanh.f32 %v874_v39  ;;  %v876_v42 = vmul.f32 0.7978846, %v872_v40  ;;  %v1767_v38 = vld [vmem:[#allocation7 + $0x188] ss:$36 sps:$4 sm:$0xff]  }
 0x864   :  { %1790 = vtanh.f32 %v875_v41 }
 0x865   :  { %1792 = vtanh.f32 %v876_v42 }
 0x86c   :  { %v1787_v43 = vpop.eup %1786 }
 0x86d   :  { %v1789_v44 = vpop.eup %1788  ;;  %v881_v45 = vadd.f32 1.0, %v1787_v43 }
 0x86e   :  { %v1791_v46 = vpop.eup %1790  ;;  %v882_v47 = vadd.f32 1.0, %v1789_v44 }
 0x86f   :  { %v1793_v48 = vpop.eup %1792  ;;  %v885_v49 = vmul.f32 0.5, %v881_v45  ;;  %v883_v51 = vadd.f32 1.0, %v1791_v46  ;;  %v1491_v46 = vld [vmem:[#allocation5 + $0xb] ss:$0 sm:$0xff] }
 0x870   :  { %v884_v52 = vadd.f32 1.0, %v1793_v48  ;;  %v886_v53 = vmul.f32 0.5, %v882_v47 }
 0x871   :  { %v887_v54 = vmul.f32 0.5, %v883_v51  ;;  %v889_v56 = vmul.f32 %v885_v49, %v849_v17 }
 0x872   :  { %v888_v55 = vmul.f32 0.5, %v884_v52  ;;  %v890_v60 = vmul.f32 %v886_v53, %v851_v19  ;;  %v1492_v52 = vld [vmem:[#allocation5 + $0xc] ss:$0 sm:$0xff] }
 0x873   :  { %v891_v57 = vmul.f32 %v887_v54, %v853_v22 }
 0x874   :  { %v892_v61 = vmul.f32 %v888_v55, %v855_v26  ;;  %v1747_v26 = vld [vmem:[#allocation7 + $0xf0] ss:$36 sps:$4 sm:$0xff]  }
 0x875   :  { %v893_v62 = vpack.c.bf16 %v891_v57, %v889_v56  ;;  %v1768_v57 = vld [vmem:[#allocation7 + $0x1d0] ss:$36 sps:$4 sm:$0xff]  }
 0x876   :  { %v894_v63 = vpack.c.bf16 %v892_v61, %v890_v60  ;;  %v1769_v60 = vld [vmem:[#allocation7 + $0x218] ss:$36 sps:$4 sm:$0xff]   ;;  %v1510_v61 = vld [vmem:[#allocation5 + $0xd] ss:$0 sm:$0xff] }
 0x878   :  { %1060 = vmatprep.mubr.bf16.mxu0 %v894_v63 }
 0x879   :  { %1061 = vmatmul.mubr.bf16.vlgmr.msra.gmra.mrb[8].mxu0 %v893_v62  ;;  %v1509_v62 = vld [vmem:[#allocation5 + $0xf] ss:$0 sm:$0xff] }
 0x87a   :  { %1641 = vmatprep.mubr.msk.bf16.mxu0 %vm1894_vm0, %v1892_v24  ;;  %1626 = vmatpush3.bf16.msra.mxu0 %v1762_v33 }
 0x87b   :  { %1627 = vmatprep.subr.bf16.mxu0 %v1892_v24 }
 0x87e   :  { %1628 = vmatpush3.bf16.msra.mxu0 %v1763_v34 }
 0x87f   :  { %1629 = vmatprep.subr.bf16.mxu0 %v1892_v24 }
 0x882   :  { %1630 = vmatpush3.bf16.msra.mxu0 %v1764_v35 }
 0x883   :  { %1631 = vmatprep.subr.bf16.mxu0 %v1892_v24 }
 0x886   :  { %1632 = vmatpush3.bf16.msra.mxu0 %v1765_v36 }
 0x887   :  { %1633 = vmatprep.subr.bf16.mxu0 %v1892_v24 }
 0x88a   :  { %1634 = vmatpush3.bf16.msra.mxu0 %v1766_v37 }
 0x88b   :  { %1635 = vmatprep.subr.bf16.mxu0 %v1892_v24 }
 0x88e   :  { %1636 = vmatpush3.bf16.msra.mxu0 %v1767_v38 }
 0x88f   :  { %1637 = vmatprep.subr.bf16.mxu0 %v1892_v24 }
 0x892   :  { %1638 = vmatpush3.bf16.msra.mxu0 %v1768_v57 }
 0x893   :  { %1639 = vmatprep.subr.bf16.mxu0 %v1892_v24 }
 0x896   :  { %1640 = vmatpush3.bf16.msra.mxu0 %v1769_v60 }
 0x94c   :  { %v1558_v0 = vpop.f32.mrb[8].mxu0 }
 0x94d   :  { %v1559_v2 = vpop.f32.mrb[9].mxu0 }
 0x94e   :  { %v1560_v3 = vadd.f32 %v1559_v2, %v1558_v0  ;;  %v1561_v4 = vpop.f32.mrb[10].mxu0 }
 0x94f   :  { %v1562_v5 = vpop.f32.mrb[11].mxu0 }
 0x950   :  { %v1063_v8 = vadd.f32 %v1560_v3, %v1474_v1  ;;  %v1563_v50 = vadd.f32 %v1562_v5, %v1561_v4 }
 0x952   :  { %v1066_v9 = vadd.f32 %v1563_v50, %v1474_v1  ;;  %v1069_v10 = vadd.f32 %v1063_v8, %v2086_v58 }
 0x954   :  { %1071 = vadd.xlane.f32.xlu0 %v1069_v10  ;;  %v1070_v11 = vadd.f32 %v1066_v9, %v2088_v59  ;;  %v1746_v59 = vld [vmem:[#allocation7 + $0xac] ss:$36 sps:$4 sm:$0xff]  }
 0x955   :  { %1208 = vmatprep.subr.bf16.mxu1 %v1746_v59 }
 0x956   :  { %1073 = vadd.xlane.f32.xlu1 %v1070_v11  ;;  %1209 = vmatpush1.bf16.msra.mxu1 %v1744_v23 }
 0x957   :  { %1210 = vmatprep.subr.bf16.mxu1 %v1749_v25 }
 0x95a   :  { %1211 = vmatpush1.bf16.msra.mxu1 %v1747_v26 }
 0x95b   :  { %1212 = vmatprep.subr.bf16.mxu1 %v1752_v27 }
 0x95e   :  { %1213 = vmatpush1.bf16.msra.mxu1 %v1750_v28 }
 0x95f   :  { %1214 = vmatprep.subr.bf16.mxu1 %v1755_v29 }
 0x962   :  { %1215 = vmatpush1.bf16.msra.mxu1 %v1753_v30 }
 0x963   :  { %1216 = vmatprep.subr.bf16.mxu1 %v1758_v31 }
 0x966   :  { %1217 = vmatpush1.bf16.msra.mxu1 %v1756_v6 }
 0x967   :  { %1218 = vmatprep.subr.bf16.mxu1 %v1761_v7 }
 0x96a   :  { %1219 = vmatpush1.bf16.msra.mxu1 %v1759_v32 }
 0x9e1   :  { %v1072_v16 = vpop.xlane.xlu0 %1071 }
 0x9e2   :  { %v1075_v17 = vmul.f32 0.0078125, %v1072_v16 }
 0x9e3   :  { %v1074_v18 = vpop.xlane.xlu1 %1073 }
 0x9e4   :  { %v1077_v19 = vsub.f32 %v1069_v10, %v1075_v17  ;;  %v1076_v20 = vmul.f32 0.0078125, %v1074_v18  ;;  %v1511_v10 = vld [vmem:[#allocation5 + $0xe] ss:$0 sm:$0xff] }
 0x9e6   :  { %v1078_v21 = vsub.f32 %v1070_v11, %v1076_v20  ;;  %v1079_v22 = vmul.f32 %v1077_v19, %v1077_v19 }
 0x9e8   :  { %1081 = vadd.xlane.f32.xlu0 %v1079_v22  ;;  %v1080_v58 = vmul.f32 %v1078_v21, %v1078_v21 }
 0x9ea   :  { %1083 = vadd.xlane.f32.xlu1 %v1080_v58 }
 0xa75   :  { %v1082_v39 = vpop.xlane.xlu0 %1081 }
 0xa76   :  { %v1085_v40 = vmul.f32 0.0078125, %v1082_v39 }
 0xa77   :  { %v1084_v41 = vpop.xlane.xlu1 %1083 }
 0xa78   :  { %v1087_v42 = vadd.f32 1e-12, %v1085_v40  ;;  %v1086_v43 = vmul.f32 0.0078125, %v1084_v41 }
 0xa7a   :  { %1794 = vrsqrt.f32 %v1087_v42  ;;  %v1088_v44 = vadd.f32 1e-12, %v1086_v43 }
 0xa7c   :  { %1796 = vrsqrt.f32 %v1088_v44 }
 0xa84   :  { %v1795_v45 = vpop.eup %1794 }
 0xa85   :  { %v1091_v47 = vmul.f32 %v1795_v45, %v1077_v19 }
 0xa86   :  { %v1797_v48 = vpop.eup %1796 }
 0xa87   :  { %v1092_v49 = vmul.f32 %v1797_v48, %v1078_v21  ;;  %v1098_v51 = vmul.f32 %v1491_v46, %v1091_v47 }
 0xa89   :  { %v1099_v53 = vmul.f32 %v1491_v46, %v1092_v49  ;;  %v1105_v54 = vadd.f32 %v1492_v52, %v1098_v51 }
 0xa8b   :  { %v1106_v55 = vadd.f32 %v1492_v52, %v1099_v53 }
 0xa8d   :  { %v1107_v56 = vpack.c.bf16 %v1106_v55, %v1105_v54 }
 0xa8f   :  { %1237 = vmatmul.mubr.bf16.vlgmr.msra.gmra.mrb[16].mxu1 %v1107_v56 }
 0xb62   :  { %v1238_v63 = vpop.f32.mrb[16].mxu1 }
 0xb63   :  { %v1259_v0 = vadd.f32 %v1510_v61, %v1238_v63  ;;  %v1240_v1 = vpop.f32.mrb[17].mxu1 }
 0xb64   :  { %v1252_v2 = vadd.f32 %v1509_v62, %v1240_v1  ;;  %v1242_v3 = vpop.f32.mrb[18].mxu1 }
 0xb65   :  { %v1260_v4 = vadd.f32 %v1510_v61, %v1242_v3  ;;  %v1244_v5 = vpop.f32.mrb[19].mxu1  ;;  %v1261_v50 = vmax.f32 %v1259_v0, 0.0 }
 0xb66   :  { %1374 = vst [vmem:[%s2123_s6] sm:$0xff] %v1252_v2  ;;  %v1253_v8 = vadd.f32 %v1509_v62, %v1244_v5 }
 0xb67   :  { %v1262_v9 = vmax.f32 %v1260_v4, 0.0 }
 0xb68   :  { %1375 = vst [vmem:[%s2123_s6 + $0x8] sm:$0xff] %v1253_v8 }
 0xb69   :  { %v1263_v24 = vpack.c.bf16 %v1262_v9, %v1261_v50 }
 0xb6b   :  { %1642 = vmatmul.mubr.bf16.vlgmr.msra.gmra.mrb[12].mxu0 %v1263_v24 }
 0xc3e   :  { %v1367_v11 = vpop.f32.mrb[12].mxu0 }
 0xc3f   :  { %v1368_v12 = vadd.f32 %v1511_v10, %v1367_v11  ;;  %v1643_v13 = vpop.f32.mrb[13].mxu0 }
 0xc40   :  { %v1370_v14 = vpop.f32.mrb[14].mxu0 }
 0xc41   :  { %1376 = vst [vmem:[%s2123_s6 + $0x10] sm:$0xff] %v1368_v12  ;;  %v1371_v15 = vadd.f32 %v1511_v10, %v1370_v14  ;;  %v1644_v16 = vpop.f32.mrb[15].mxu0 }
 0xc43   :  { %1377 = vst [vmem:[%s2123_s6 + $0x18] sm:$0xff] %v1371_v15 }
 0xc44   :  { %1382 = vsyncpa [#allocation6], 1 }
 0xc45   :  { %1383 = vsyncpa [#allocation8], 1 }

</bundles_post_ra>
